<compile_context>
chip_gen: v7x
topology: tpu7x:2x2x1
jax: 0.10.0
libtpu: 0.0.40
codegen_flags: <defaults>
</compile_context>

<pallas_src>
import jax
import jax.numpy as jnp
from jax.experimental import pallas as pl
from jax.experimental.pallas import tpu as pltpu


# ----------------------------------------------------------------------------
# Kernel 1: relu(conv1(x)) as a per-pixel matmul over channels.
#   x block : (TILE_P, Cin)
#   out     : (TILE_P, 128)
# Cin is tiny (3), so the contraction is unrolled as VPU broadcast-FMAs.
# ----------------------------------------------------------------------------
def conv1_relu_kernel(x_ref, w_ref, b_ref, v1_ref):
    x = x_ref[...]                       # (TILE_P, Cin)
    w = w_ref[...]                       # (Cin, 128)
    cin = x.shape[1]
    acc = x[:, 0:1] * w[0:1, :]          # (TILE_P, 128)
    for c in range(1, cin):              # static, tiny unroll
        acc = acc + x[:, c:c + 1] * w[c:c + 1, :]
    v1_ref[...] = jnp.maximum(acc + b_ref[...], 0.0)


# ----------------------------------------------------------------------------
# Kernel 2: fc2(relu(fc1(v4))), with the fc1 reduction (F_in) tiled over the
# grid and accumulated in a VMEM scratch.
#   v4 block  : (N, TILE_K)
#   wf1 block : (TILE_K, 128)
#   acc       : (N, 128) f32 scratch, resident across grid steps
# ----------------------------------------------------------------------------
def mlp_kernel(v4_ref, wf1_ref, bf1_ref, wf2_ref, bf2_ref, out_ref, acc_ref):
    k = pl.program_id(0)

    @pl.when(k == 0)
    def _():
        acc_ref[...] = jnp.zeros_like(acc_ref)

    acc_ref[...] += jnp.dot(v4_ref[...], wf1_ref[...],
                            preferred_element_type=jnp.float32)

    @pl.when(k == pl.num_programs(0) - 1)
    def _():
        v5 = jnp.maximum(acc_ref[...] + bf1_ref[...], 0.0)          # relu(fc1)
        out_ref[...] = (jnp.dot(v5, wf2_ref[...],
                                preferred_element_type=jnp.float32)
                        + bf2_ref[...]).astype(out_ref.dtype)        # fc2


def _pick_tile(total, preferred):
    """Largest candidate that evenly divides `total`; fallback = full extent."""
    for t in preferred:
        if t <= total and total % t == 0:
            return t
    return total


def model_forward(x_nchw, params):
    """Reproduces Model.forward. x_nchw: (N, 3, H, W) float32 -> (N, 10)."""
    N, Cin, H, W = x_nchw.shape
    HW = H * W
    P = N * HW
    F_in = 128 * HW

    w1t, b1, wf1t, bf1, wf2t, bf2 = params

    # NCHW -> (pixels, channels); small one-time transpose of the 3-channel input.
    x_pix = jnp.transpose(x_nchw, (0, 2, 3, 1)).reshape(P, Cin)

    # ---------------- conv1 + ReLU ----------------
    tile_p = _pick_tile(P, (256, 128, 64, 32, 16, 8))
    conv_cost = pl.CostEstimate(
        flops=2 * P * Cin * 128,
        transcendentals=0,
        bytes_accessed=4 * (P * Cin + Cin * 128 + 128 + P * 128))

    v1_pix = pl.pallas_call(
        conv1_relu_kernel,
        out_shape=jax.ShapeDtypeStruct((P, 128), jnp.float32),
        grid_spec=pltpu.PrefetchScalarGridSpec(
            num_scalar_prefetch=0,
            grid=(P // tile_p,),
            in_specs=[
                pl.BlockSpec((tile_p, Cin), lambda i: (i, 0)),
                pl.BlockSpec((Cin, 128), lambda i: (0, 0)),
                pl.BlockSpec((1, 128), lambda i: (0, 0)),
            ],
            out_specs=pl.BlockSpec((tile_p, 128), lambda i: (i, 0))),
        compiler_params=pltpu.CompilerParams(
            dimension_semantics=("parallel",)),
        cost_estimate=conv_cost,
    )(x_pix, w1t, b1)

    # Free reshape: rows are already in NHWC-flatten order per sample, and the
    # matching permutation was folded into wf1t at init time.
    v4 = v1_pix.reshape(N, F_in)

    # ---------------- fc1 + ReLU + fc2 ----------------
    tile_k = _pick_tile(F_in, (2048, 1024, 512, 256, 128))
    mlp_cost = pl.CostEstimate(
        flops=2 * N * F_in * 128 + 2 * N * 128 * 10,
        transcendentals=0,
        bytes_accessed=4 * (N * F_in + F_in * 128 + 128
                            + 128 * 10 + 10 + N * 10))

    out = pl.pallas_call(
        mlp_kernel,
        out_shape=jax.ShapeDtypeStruct((N, 10), jnp.float32),
        grid_spec=pltpu.PrefetchScalarGridSpec(
            num_scalar_prefetch=0,
            grid=(F_in // tile_k,),
            in_specs=[
                pl.BlockSpec((N, tile_k), lambda k: (0, k)),
                pl.BlockSpec((tile_k, 128), lambda k: (k, 0)),
                pl.BlockSpec((1, 128), lambda k: (0, 0)),
                pl.BlockSpec((128, 10), lambda k: (0, 0)),
                pl.BlockSpec((1, 10), lambda k: (0, 0)),
            ],
            out_specs=pl.BlockSpec((N, 10), lambda k: (0, 0)),
            scratch_shapes=[pltpu.VMEM((N, 128), jnp.float32)]),
        compiler_params=pltpu.CompilerParams(
            dimension_semantics=("arbitrary",)),
        cost_estimate=mlp_cost,
    )(v4, wf1t, bf1, wf2t, bf2)

    return out


def init_params(key, H, W):
    """Deterministic synthetic parameters (shapes per Model.__init__, except the
    documented fc1 in_features fix).  Weights are stored pre-transposed (in, out);
    fc1's weight rows are permuted from NCHW-flatten order to NHWC-flatten order
    so the conv output can be consumed without an activation transpose."""
    ks = jax.random.split(key, 6)
    HW = H * W
    F_in = 128 * HW

    def u(k, shape, fan_in):
        bound = 1.0 / jnp.sqrt(fan_in)
        return jax.random.uniform(k, shape, jnp.float32, -bound, bound)

    w1t = u(ks[0], (3, 128), 3)            # conv1: Conv2d(3, 128, 1)
    b1 = u(ks[1], (1, 128), 3)

    # fc1 weight generated with rows in torch's NCHW-flatten order (c*HW + p),
    # then permuted once to NHWC-flatten order (p*128 + c).
    wf1t_nchw = u(ks[2], (F_in, 128), F_in)
    wf1t = (wf1t_nchw.reshape(128, HW, 128)    # [c, p, out]
            .transpose(1, 0, 2)                # [p, c, out]
            .reshape(F_in, 128))
    bf1 = u(ks[3], (1, 128), F_in)

    wf2t = u(ks[4], (128, 10), 128)        # fc2: Linear(128, 10)
    bf2 = u(ks[5], (1, 10), 128)
    return (w1t, b1, wf1t, bf1, wf2t, bf2)


def _reference_forward(x_nchw, params):
    """Pure-JAX reference on the same (permuted) parameters."""
    N, Cin, H, W = x_nchw.shape
    w1t, b1, wf1t, bf1, wf2t, bf2 = params
    x_pix = jnp.transpose(x_nchw, (0, 2, 3, 1)).reshape(N * H * W, Cin)
    v1 = jnp.maximum(x_pix @ w1t + b1, 0.0)
    v4 = v1.reshape(N, 128 * H * W)
    v5 = jnp.maximum(v4 @ wf1t + bf1, 0.0)
    return v5 @ wf2t + bf2


if __name__ == "__main__":
    key = jax.random.PRNGKey(0)
    k_x, k_p = jax.random.split(key)

    N, C, H, W = 2, 3, 16, 16
    x1 = jax.random.normal(k_x, (N, C, H, W), jnp.float32)
    params = init_params(k_p, H, W)

    out = jax.jit(model_forward)(x1, params)
    out = jax.block_until_ready(out)
    assert out.shape == (N, 10) and out.dtype == jnp.float32

    ref = _reference_forward(x1, params)
    assert jnp.allclose(out, ref, rtol=1e-2, atol=1e-2)

    print("KERNEL_OK")
</pallas_src>

<mosaic_0001>
module attributes {stable_mosaic.version = 11 : i64} {
  func.func @conv1_relu_kernel(%arg0: i32, %arg1: memref<256x3xf32, #tpu.memory_space<vmem>>, %arg2: memref<3x128xf32, #tpu.memory_space<vmem>>, %arg3: memref<1x128xf32, #tpu.memory_space<vmem>>, %arg4: memref<256x128xf32, #tpu.memory_space<vmem>>) attributes {dimension_semantics = [#tpu.dimension_semantics<parallel>], iteration_bounds = array<i64: 2>, scalar_prefetch = 0 : i64, scratch_operands = 0 : i64, tpu.core_type = #tpu.core_type<tc>, window_params = [{transform_indices = @transform_0, window_bounds = array<i64: 256, 3>}, {pipeline_mode = #tpu.pipeline_mode<synchronous>, transform_indices = @transform_1, window_bounds = array<i64: 3, 128>}, {pipeline_mode = #tpu.pipeline_mode<synchronous>, transform_indices = @transform_2, window_bounds = array<i64: 1, 128>}, {transform_indices = @transform_3, window_bounds = array<i64: 256, 128>}]} {
    %c0 = arith.constant 0 : index
    %c0_0 = arith.constant 0 : index
    %0 = vector.load %arg1[%c0, %c0_0] : memref<256x3xf32, #tpu.memory_space<vmem>>, vector<256x3xf32>
    %c0_1 = arith.constant 0 : index
    %c0_2 = arith.constant 0 : index
    %1 = vector.load %arg2[%c0_1, %c0_2] : memref<3x128xf32, #tpu.memory_space<vmem>>, vector<3x128xf32>
    %2 = vector.extract_strided_slice %0 {offsets = [0, 0], sizes = [256, 1], strides = [1, 1]} : vector<256x3xf32> to vector<256x1xf32>
    %3 = vector.extract_strided_slice %1 {offsets = [0, 0], sizes = [1, 128], strides = [1, 1]} : vector<3x128xf32> to vector<1x128xf32>
    %4 = vector.broadcast %2 : vector<256x1xf32> to vector<256x128xf32>
    %5 = vector.broadcast %3 : vector<1x128xf32> to vector<256x128xf32>
    %6 = arith.mulf %4, %5 : vector<256x128xf32>
    %7 = vector.extract_strided_slice %0 {offsets = [0, 1], sizes = [256, 1], strides = [1, 1]} : vector<256x3xf32> to vector<256x1xf32>
    %8 = vector.extract_strided_slice %1 {offsets = [1, 0], sizes = [1, 128], strides = [1, 1]} : vector<3x128xf32> to vector<1x128xf32>
    %9 = vector.broadcast %7 : vector<256x1xf32> to vector<256x128xf32>
    %10 = vector.broadcast %8 : vector<1x128xf32> to vector<256x128xf32>
    %11 = arith.mulf %9, %10 : vector<256x128xf32>
    %12 = arith.addf %6, %11 : vector<256x128xf32>
    %13 = vector.extract_strided_slice %0 {offsets = [0, 2], sizes = [256, 1], strides = [1, 1]} : vector<256x3xf32> to vector<256x1xf32>
    %14 = vector.extract_strided_slice %1 {offsets = [2, 0], sizes = [1, 128], strides = [1, 1]} : vector<3x128xf32> to vector<1x128xf32>
    %15 = vector.broadcast %13 : vector<256x1xf32> to vector<256x128xf32>
    %16 = vector.broadcast %14 : vector<1x128xf32> to vector<256x128xf32>
    %17 = arith.mulf %15, %16 : vector<256x128xf32>
    %18 = arith.addf %12, %17 : vector<256x128xf32>
    %c0_3 = arith.constant 0 : index
    %c0_4 = arith.constant 0 : index
    %19 = vector.load %arg3[%c0_3, %c0_4] : memref<1x128xf32, #tpu.memory_space<vmem>>, vector<1x128xf32>
    %20 = vector.broadcast %19 : vector<1x128xf32> to vector<256x128xf32>
    %21 = arith.addf %18, %20 : vector<256x128xf32>
    %cst = arith.constant 0.000000e+00 : f32
    %22 = vector.broadcast %cst : f32 to vector<256x128xf32>
    %23 = arith.maximumf %21, %22 : vector<256x128xf32>
    %c0_5 = arith.constant 0 : index
    %c0_6 = arith.constant 0 : index
    %24 = vector.load %arg4[%c0_5, %c0_6] : memref<256x128xf32, #tpu.memory_space<vmem>>, vector<256x128xf32>
    tpu.vector_store %arg4[%c0_5, %c0_6], %23 {strides = array<i32>} : memref<256x128xf32, #tpu.memory_space<vmem>>, vector<256x128xf32>,
    return
  }
  func.func @transform_0(%arg0: i32) -> (i32, i32) {
    %c0_i32 = arith.constant 0 : i32
    %c0_i32_0 = arith.constant 0 : i32
    return %arg0, %c0_i32 : i32, i32
  }
  func.func @transform_1(%arg0: i32) -> (i32, i32) {
    %c0_i32 = arith.constant 0 : i32
    %c0_i32_0 = arith.constant 0 : i32
    %c0_i32_1 = arith.constant 0 : i32
    return %c0_i32, %c0_i32_0 : i32, i32
  }
  func.func @transform_2(%arg0: i32) -> (i32, i32) {
    %c0_i32 = arith.constant 0 : i32
    %c0_i32_0 = arith.constant 0 : i32
    %c0_i32_1 = arith.constant 0 : i32
    return %c0_i32, %c0_i32_0 : i32, i32
  }
  func.func @transform_3(%arg0: i32) -> (i32, i32) {
    %c0_i32 = arith.constant 0 : i32
    %c0_i32_0 = arith.constant 0 : i32
    return %arg0, %c0_i32 : i32, i32
  }
}

module attributes {stable_mosaic.version = 11 : i64} {
  func.func @mlp_kernel(%arg0: i32, %arg1: memref<2x2048xf32, #tpu.memory_space<vmem>>, %arg2: memref<2048x128xf32, #tpu.memory_space<vmem>>, %arg3: memref<1x128xf32, #tpu.memory_space<vmem>>, %arg4: memref<128x10xf32, #tpu.memory_space<vmem>>, %arg5: memref<1x10xf32, #tpu.memory_space<vmem>>, %arg6: memref<2x10xf32, #tpu.memory_space<vmem>>, %arg7: memref<2x128xf32, #tpu.memory_space<vmem>>) attributes {dimension_semantics = [#tpu.dimension_semantics<arbitrary>], iteration_bounds = array<i64: 16>, scalar_prefetch = 0 : i64, scratch_operands = 1 : i64, tpu.core_type = #tpu.core_type<tc>, window_params = [{transform_indices = @transform_0, window_bounds = array<i64: 2, 2048>}, {transform_indices = @transform_1, window_bounds = array<i64: 2048, 128>}, {pipeline_mode = #tpu.pipeline_mode<synchronous>, transform_indices = @transform_2, window_bounds = array<i64: 1, 128>}, {pipeline_mode = #tpu.pipeline_mode<synchronous>, transform_indices = @transform_3, window_bounds = array<i64: 128, 10>}, {pipeline_mode = #tpu.pipeline_mode<synchronous>, transform_indices = @transform_4, window_bounds = array<i64: 1, 10>}, {pipeline_mode = #tpu.pipeline_mode<synchronous>, transform_indices = @transform_5, window_bounds = array<i64: 2, 10>}]} {
    %c0_i32 = arith.constant 0 : i32
    %0 = arith.cmpi eq, %arg0, %c0_i32 : i32
    %1 = arith.extui %0 : i1 to i32
    %c0_i32_0 = arith.constant 0 : i32
    %2 = arith.cmpi ne, %1, %c0_i32_0 : i32
    scf.if %2 {
      %cst_9 = arith.constant 0.000000e+00 : f32
      %12 = vector.broadcast %cst_9 : f32 to vector<2x128xf32>
      %c0_10 = arith.constant 0 : index
      %c0_11 = arith.constant 0 : index
      %13 = vector.load %arg7[%c0_10, %c0_11] : memref<2x128xf32, #tpu.memory_space<vmem>>, vector<2x128xf32>
      tpu.vector_store %arg7[%c0_10, %c0_11], %12 {strides = array<i32>} : memref<2x128xf32, #tpu.memory_space<vmem>>, vector<2x128xf32>,
    } else {
    }
    %c0 = arith.constant 0 : index
    %c0_1 = arith.constant 0 : index
    %3 = vector.load %arg7[%c0, %c0_1] : memref<2x128xf32, #tpu.memory_space<vmem>>, vector<2x128xf32>
    %c0_2 = arith.constant 0 : index
    %c0_3 = arith.constant 0 : index
    %4 = vector.load %arg1[%c0_2, %c0_3] : memref<2x2048xf32, #tpu.memory_space<vmem>>, vector<2x2048xf32>
    %c0_4 = arith.constant 0 : index
    %c0_5 = arith.constant 0 : index
    %5 = vector.load %arg2[%c0_4, %c0_5] : memref<2048x128xf32, #tpu.memory_space<vmem>>, vector<2048x128xf32>
    %cst = arith.constant dense<0.000000e+00> : vector<2x128xf32>
    %6 = tpu.matmul %4, %5, %cst {dimension_numbers = #tpu.dot_dimension_numbers<[1], [0], [0], [1], [0, 0, 1, 1], [], []>} : vector<2x2048xf32>, vector<2048x128xf32>, vector<2x128xf32> -> vector<2x128xf32>
    %7 = arith.addf %3, %6 : vector<2x128xf32>
    %c0_6 = arith.constant 0 : index
    %c0_7 = arith.constant 0 : index
    %8 = vector.load %arg7[%c0_6, %c0_7] : memref<2x128xf32, #tpu.memory_space<vmem>>, vector<2x128xf32>
    tpu.vector_store %arg7[%c0_6, %c0_7], %7 {strides = array<i32>} : memref<2x128xf32, #tpu.memory_space<vmem>>, vector<2x128xf32>,
    %c15_i32 = arith.constant 15 : i32
    %9 = arith.cmpi eq, %arg0, %c15_i32 : i32
    %10 = arith.extui %9 : i1 to i32
    %c0_i32_8 = arith.constant 0 : i32
    %11 = arith.cmpi ne, %10, %c0_i32_8 : i32
    scf.if %11 {
      %c0_9 = arith.constant 0 : index
      %c0_10 = arith.constant 0 : index
      %12 = vector.load %arg7[%c0_9, %c0_10] : memref<2x128xf32, #tpu.memory_space<vmem>>, vector<2x128xf32>
      %c0_11 = arith.constant 0 : index
      %c0_12 = arith.constant 0 : index
      %13 = vector.load %arg3[%c0_11, %c0_12] : memref<1x128xf32, #tpu.memory_space<vmem>>, vector<1x128xf32>
      %14 = vector.broadcast %13 : vector<1x128xf32> to vector<2x128xf32>
      %15 = arith.addf %12, %14 : vector<2x128xf32>
      %cst_13 = arith.constant 0.000000e+00 : f32
      %16 = vector.broadcast %cst_13 : f32 to vector<2x128xf32>
      %17 = arith.maximumf %15, %16 : vector<2x128xf32>
      %c0_14 = arith.constant 0 : index
      %c0_15 = arith.constant 0 : index
      %18 = vector.load %arg4[%c0_14, %c0_15] : memref<128x10xf32, #tpu.memory_space<vmem>>, vector<128x10xf32>
      %cst_16 = arith.constant dense<0.000000e+00> : vector<2x10xf32>
      %19 = tpu.matmul %17, %18, %cst_16 {dimension_numbers = #tpu.dot_dimension_numbers<[1], [0], [0], [1], [0, 0, 1, 1], [], []>} : vector<2x128xf32>, vector<128x10xf32>, vector<2x10xf32> -> vector<2x10xf32>
      %c0_17 = arith.constant 0 : index
      %c0_18 = arith.constant 0 : index
      %20 = vector.load %arg5[%c0_17, %c0_18] : memref<1x10xf32, #tpu.memory_space<vmem>>, vector<1x10xf32>
      %21 = vector.broadcast %20 : vector<1x10xf32> to vector<2x10xf32>
      %22 = arith.addf %19, %21 : vector<2x10xf32>
      %c0_19 = arith.constant 0 : index
      %c0_20 = arith.constant 0 : index
      %23 = vector.load %arg6[%c0_19, %c0_20] : memref<2x10xf32, #tpu.memory_space<vmem>>, vector<2x10xf32>
      tpu.vector_store %arg6[%c0_19, %c0_20], %22 {strides = array<i32>} : memref<2x10xf32, #tpu.memory_space<vmem>>, vector<2x10xf32>,
    } else {
    }
    return
  }
  func.func @transform_0(%arg0: i32) -> (i32, i32) {
    %c0_i32 = arith.constant 0 : i32
    %c0_i32_0 = arith.constant 0 : i32
    return %c0_i32, %arg0 : i32, i32
  }
  func.func @transform_1(%arg0: i32) -> (i32, i32) {
    %c0_i32 = arith.constant 0 : i32
    %c0_i32_0 = arith.constant 0 : i32
    return %arg0, %c0_i32 : i32, i32
  }
  func.func @transform_2(%arg0: i32) -> (i32, i32) {
    %c0_i32 = arith.constant 0 : i32
    %c0_i32_0 = arith.constant 0 : i32
    %c0_i32_1 = arith.constant 0 : i32
    return %c0_i32, %c0_i32_0 : i32, i32
  }
  func.func @transform_3(%arg0: i32) -> (i32, i32) {
    %c0_i32 = arith.constant 0 : i32
    %c0_i32_0 = arith.constant 0 : i32
    %c0_i32_1 = arith.constant 0 : i32
    return %c0_i32, %c0_i32_0 : i32, i32
  }
  func.func @transform_4(%arg0: i32) -> (i32, i32) {
    %c0_i32 = arith.constant 0 : i32
    %c0_i32_0 = arith.constant 0 : i32
    %c0_i32_1 = arith.constant 0 : i32
    return %c0_i32, %c0_i32_0 : i32, i32
  }
  func.func @transform_5(%arg0: i32) -> (i32, i32) {
    %c0_i32 = arith.constant 0 : i32
    %c0_i32_0 = arith.constant 0 : i32
    %c0_i32_1 = arith.constant 0 : i32
    return %c0_i32, %c0_i32_0 : i32, i32
  }
}

</mosaic_0001>

<bundles_post_ra>
// kernel: model_forward.2
= control target key start
LH: loop header
LB: loop body
LE: loop exit
PB: predicated region body
PF: predicated region fallthrough
CT: control target
= control target key end

     0   :  { %8 = vsyncpa [#allocation3], 0  ;;  %s1823_s0 = inlined_call_operand.vmem [shape: f32[512,3], index: 0, kind: input, shape index: {}]   ;;  %s1824_s1 = inlined_call_operand.hbm [shape: f32[3,128], index: 1, kind: input, shape index: {}]   ;;  %s1825_s2 = inlined_call_operand.hbm [shape: f32[1,128], index: 2, kind: input, shape index: {}]   ;;  %s1826_s3 = inlined_call_operand.vmem [shape: f32[512,128], index: 3, kind: output, shape index: {}]  }
   0x1   :  { %9 = vsyncpa [#allocation5], 0  ;;  %s1153_s12 = smov 0  }
   0x2 LB: > { %s1002_s13 = sadd.s32 4294967295, %s1126_s12   ;;  %p1004_p0 = scmp.ge.s32.totalorder %s1126_s12, 1  ;;  %s1126_s12 = sphi %s1153_s12, %s15_s12  }
   0x3   : > { %p114_p1 = scmp.lt.s32.totalorder %s1126_s12, 3  ;;  %p1163_p2 = scmp.eq.s32.totalorder %s1002_s13, 0 }
   0x4   : > { %s1128_s16 = smov [#allocation2]   ;;  %s1129_s18 = smov [#allocation4]  }
   0x5   : > { %s1830_s14 = scalar_select %p1163_p2, 1, 0 }
   0x6   : > { %p1167_p3 = pnand %p1004_p0, %p114_p1  ;;  %s127_s17 = sshll.u32 %s1128_s16, 4  ;;  %s128_s17 = int_to_ptr.vmem [resolvable:$true] %s127_s17 }
   0x7   : > { %s138_s19 = sshll.u32 %s1129_s18, 4  ;;  %s1056_s23 = scalar_lea.hbm %s1824_s1, 64  ;;  %s1179_s19 = int_to_ptr.vmem [resolvable:$true] %s138_s19 }
   0x8   : > { %s1831_s15 = scalar_select %p1167_p3, 1, 0 }
   0x9   : > { %p1026_p4 = pneg %p1167_p3  ;;  %p1057_p6 = scmp.ne.s32.totalorder %s1824_s1, %s1056_s23 }
   0xa   : > { %p1063_p10 = scmp.lt.u32.totalorder %s1056_s23, %s1824_s1 }
   0xb   : > { %p1175_p5 = pnand %p1163_p2, %p1026_p4 }
   0xd   : > { %p1058_p7 = pneg %p1175_p5 }
   0xf   : > { %p1059_p8 = pnand %p1058_p7, %p1057_p6 }
  0x11   : > { %p1060_p9 = pneg %p1059_p8 }
  0x13   : > { %p1065_p11 = pnand %p1063_p10, %p1060_p9 }
  0x15   : > { %1068 = shalt.err (!%p1065_p11)
}
  0x16   : > { %s1069_s28 = scalar_lea.vmem %s128_s17, 64  ;;  %p1077_p1 = scmp.lt.s32.totalorder %s128_s17, %s128_s17 }
  0x17   : > { %p1070_p12 = scmp.ne.s32.totalorder %s128_s17, %s1069_s28  ;;  %p1078_p4 = scmp.lt.s32.totalorder %s1069_s28, %s1069_s28 }
  0x19   : > { %p1072_p13 = pnand %p1070_p12, %p1058_p7  ;;  %p1079_p2 = por %p1078_p4, %p1077_p1 }
  0x1b   : > { %p1073_p0 = pneg %p1072_p13 }
  0x1d   : > { %p1080_p3 = pnand %p1079_p2, %p1073_p0 }
  0x1f   : > { %1083 = shalt.err (!%p1080_p3)
}
  0x20   : > { %1029 = dma.hbm_to_vmem [thread:$0]  (!%p1175_p5), %s1824_s1, 64, %s128_s17, [#allocation3]  }
  0x21   : > { %s1084_s6 = scalar_lea.hbm %s1825_s2, 16 }
  0x22   : > { %p1085_p6 = scmp.ne.s32.totalorder %s1825_s2, %s1084_s6  ;;  %p1091_p3 = scmp.lt.u32.totalorder %s1084_s6, %s1825_s2 }
  0x24   : > { %p1087_p8 = pnand %p1085_p6, %p1058_p7 }
  0x26   : > { %p1088_p2 = pneg %p1087_p8 }
  0x28   : > { %p1093_p9 = pnand %p1091_p3, %p1088_p2 }
  0x2a   : > { %1096 = shalt.err (!%p1093_p9)
}
  0x2b   : > { %s1097_s11 = scalar_lea.vmem %s1179_s19, 16  ;;  %s1104_s16 = scalar_lea.vmem %s1179_s19, 32 }
  0x2c   : > { %p1098_p10 = scmp.ne.s32.totalorder %s1179_s19, %s1097_s11  ;;  %p1105_p13 = scmp.lt.s32.totalorder %s1179_s19, %s1179_s19 }
  0x2d   : > { %p1106_p0 = scmp.lt.s32.totalorder %s1104_s16, %s1097_s11 }
  0x2e   : > { %p1100_p11 = pnand %p1098_p10, %p1058_p7 }
  0x2f   : > { %p1107_p1 = por %p1106_p0, %p1105_p13 }
  0x30   : > { %p1101_p12 = pneg %p1100_p11 }
  0x32   : > { %p1108_p4 = pnand %p1107_p1, %p1101_p12 }
  0x34   : > { %1111 = shalt.err (!%p1108_p4)
}
  0x35   : > { %1032 = dma.hbm_to_vmem [thread:$0]  (!%p1175_p5), %s1825_s2, 16, %s1179_s19, [#allocation5]  }
  0x36   : > { %p1833_p6 = scmp.ne.s32.totalorder %s1831_s15, 0 }
  0x38   : > { %160 = sbr.rel (%p1833_p6) target bundleno = 406 (0x196), region = 32 }
  0x3f   : > { %p1834_p7 = scmp.ne.s32.totalorder %s1830_s14, 0 }
  0x41   : > { %1117 = dma.done.wait (%p1834_p7), [#allocation3], 64  }
  0x42   : > { %1119 = vsyncadd (%p1834_p7), [#allocation3], 4294967232 }
  0x43   : > { %1121 = dma.done.wait (%p1834_p7), [#allocation5], 16  }
  0x44   : > { %1123 = vsyncadd (%p1834_p7), [#allocation5], 4294967280  ;;  %s1011_s20 = sshll.u32 %s1002_s13, 5  ;;  %v1130_v0 = vmov 0   ;;  %v1131_v33 = vmov 1   ;;  %v1132_v36 = vmov 2   ;;  %v393_v59 = vlaneseq }
  0x45   : > { %1051 = vset.pattern.permute.xlu1 %v1130_v0  ;;  %1050 = vset.pattern.permute.xlu0 %v1130_v0  ;;  %p189_p5 = scmp.lt.s32.totalorder %s1011_s20, 63 }
  0x46   : > { %v1487_v62 = vshrl.u32 %v393_v59, 7 }
  0x47   : > { %s1838_s20 = smov (!%p189_p5, %s1011_s20), 63 }
  0x48   : > { %s1012_s15 = sshll.u32 %s1838_s20, 3 }
  0x49   : > { %s1249_s22 = scalar_lea.vmem %s1823_s0, %s1012_s15  ;;  %s1663_s23 = scalar_lea.vmem %s1826_s3, %s1012_s15 }
  0x4a   : > { %v1252_v1 = vld [vmem:[%s1249_s22 + $0x10] sm:$0xff]  ;;  %v1255_v2 = vld [vmem:[%s1249_s22] sm:$0xff]  ;;  %v1260_v3 = vld [vmem:[%s1249_s22 + $0x18] sm:$0xff] }
  0x4b   : > { %245 = vperm.xlu1 %1051, %v1252_v1   ;;  %235 = vperm.xlu0 %1050, %v1255_v2   ;;  %v1263_v4 = vld [vmem:[%s1249_s22 + $0x8] sm:$0xff]  ;;  %v1271_v6 = vld [vmem:[%s1249_s22 + $0x20] sm:$0xff]  ;;  %v1276_v7 = vld [vmem:[%s1249_s22 + $0x38] sm:$0xff] }
  0x4c   : > { %v1268_v5 = vld [vmem:[%s1249_s22 + $0x28] sm:$0xff]  ;;  %v1279_v8 = vld [vmem:[%s1249_s22 + $0x30] sm:$0xff]  ;;  %v1287_v10 = vld [vmem:[%s1249_s22 + $0x40] sm:$0xff] }
  0x4d   : > { %v1284_v9 = vld [vmem:[%s1249_s22 + $0x48] sm:$0xff]  ;;  %v1292_v11 = vld [vmem:[%s1249_s22 + $0x58] sm:$0xff]  ;;  %v1295_v12 = vld [vmem:[%s1249_s22 + $0x50] sm:$0xff] }
  0x4e   : > { %v1300_v13 = vld [vmem:[%s1249_s22 + $0x68] sm:$0xff]  ;;  %v1303_v14 = vld [vmem:[%s1249_s22 + $0x60] sm:$0xff]  ;;  %v1308_v15 = vld [vmem:[%s1249_s22 + $0x78] sm:$0xff] }
  0x4f   : > { %250 = vperm.xlu1 %1051, %v1260_v3   ;;  %240 = vperm.xlu0 %1050, %v1263_v4   ;;  %v1311_v16 = vld [vmem:[%s1249_s22 + $0x70] sm:$0xff]  ;;  %v1316_v17 = vld [vmem:[%s1249_s22 + $0x88] sm:$0xff]  ;;  %v1319_v18 = vld [vmem:[%s1249_s22 + $0x80] sm:$0xff] }
  0x50   : > { %v1324_v19 = vld [vmem:[%s1249_s22 + $0x98] sm:$0xff]  ;;  %v1327_v20 = vld [vmem:[%s1249_s22 + $0x90] sm:$0xff]  ;;  %v1332_v21 = vld [vmem:[%s1249_s22 + $0xa8] sm:$0xff] }
  0x51   : > { %v1335_v22 = vld [vmem:[%s1249_s22 + $0xa0] sm:$0xff]  ;;  %v1340_v23 = vld [vmem:[%s1249_s22 + $0xb8] sm:$0xff]  ;;  %v1343_v24 = vld [vmem:[%s1249_s22 + $0xb0] sm:$0xff] }
  0x52   : > { %v1348_v25 = vld [vmem:[%s1249_s22 + $0xc8] sm:$0xff]  ;;  %v1351_v26 = vld [vmem:[%s1249_s22 + $0xc0] sm:$0xff]  ;;  %v1356_v27 = vld [vmem:[%s1249_s22 + $0xd8] sm:$0xff] }
  0x53   : > { %260 = vperm.xlu1 %1051, %v1268_v5   ;;  %255 = vperm.xlu0 %1050, %v1271_v6   ;;  %v1359_v28 = vld [vmem:[%s1249_s22 + $0xd0] sm:$0xff]  ;;  %v1364_v29 = vld [vmem:[%s1249_s22 + $0xe8] sm:$0xff]  ;;  %v1367_v30 = vld [vmem:[%s1249_s22 + $0xe0] sm:$0xff] }
  0x54   : > { %v1372_v31 = vld [vmem:[%s1249_s22 + $0xf8] sm:$0xff]  ;;  %v1375_v32 = vld [vmem:[%s1249_s22 + $0xf0] sm:$0xff] }
  0x57   : > { %270 = vperm.xlu1 %1051, %v1276_v7   ;;  %265 = vperm.xlu0 %1050, %v1279_v8  }
  0x5b   : > { %280 = vperm.xlu1 %1051, %v1284_v9   ;;  %275 = vperm.xlu0 %1050, %v1287_v10  }
  0x5f   : > { %290 = vperm.xlu1 %1051, %v1292_v11   ;;  %285 = vperm.xlu0 %1050, %v1295_v12  }
  0x63   : > { %300 = vperm.xlu1 %1051, %v1300_v13   ;;  %295 = vperm.xlu0 %1050, %v1303_v14  }
  0x67   : > { %310 = vperm.xlu1 %1051, %v1308_v15   ;;  %305 = vperm.xlu0 %1050, %v1311_v16  }
  0x6b   : > { %320 = vperm.xlu1 %1051, %v1316_v17   ;;  %315 = vperm.xlu0 %1050, %v1319_v18  }
  0x6f   : > { %330 = vperm.xlu1 %1051, %v1324_v19   ;;  %325 = vperm.xlu0 %1050, %v1327_v20  }
  0x73   : > { %340 = vperm.xlu1 %1051, %v1332_v21   ;;  %335 = vperm.xlu0 %1050, %v1335_v22  }
  0x77   : > { %350 = vperm.xlu1 %1051, %v1340_v23   ;;  %345 = vperm.xlu0 %1050, %v1343_v24  }
  0x7b   : > { %360 = vperm.xlu1 %1051, %v1348_v25   ;;  %355 = vperm.xlu0 %1050, %v1351_v26  }
  0x7f   : > { %370 = vperm.xlu1 %1051, %v1356_v27   ;;  %365 = vperm.xlu0 %1050, %v1359_v28  }
  0x83   : > { %380 = vperm.xlu1 %1051, %v1364_v29   ;;  %375 = vperm.xlu0 %1050, %v1367_v30  }
  0x87   : > { %390 = vperm.xlu1 %1051, %v1372_v31   ;;  %385 = vperm.xlu0 %1050, %v1375_v32  }
  0x8b   : > { %1053 = vset.pattern.permute.xlu1 %v1131_v33  ;;  %1052 = vset.pattern.permute.xlu0 %v1131_v33 }
  0x8c   : > { %434 = vperm.xlu1 %1053, %v1263_v4   ;;  %430 = vperm.xlu0 %1052, %v1255_v2  }
  0x90   : > { %438 = vperm.xlu1 %1053, %v1252_v1   ;;  %442 = vperm.xlu0 %1052, %v1260_v3  }
  0x94   : > { %446 = vperm.xlu1 %1053, %v1271_v6   ;;  %450 = vperm.xlu0 %1052, %v1268_v5  }
  0x98   : > { %454 = vperm.xlu1 %1053, %v1279_v8   ;;  %458 = vperm.xlu0 %1052, %v1276_v7  }
  0x9c   : > { %462 = vperm.xlu1 %1053, %v1287_v10   ;;  %466 = vperm.xlu0 %1052, %v1284_v9  }
  0xa0   : > { %470 = vperm.xlu1 %1053, %v1295_v12   ;;  %474 = vperm.xlu0 %1052, %v1292_v11  }
  0xa4   : > { %478 = vperm.xlu1 %1053, %v1303_v14   ;;  %482 = vperm.xlu0 %1052, %v1300_v13  }
  0xa8   : > { %486 = vperm.xlu1 %1053, %v1311_v16   ;;  %490 = vperm.xlu0 %1052, %v1308_v15  }
  0xac   : > { %494 = vperm.xlu1 %1053, %v1319_v18   ;;  %498 = vperm.xlu0 %1052, %v1316_v17  }
  0xb0   : > { %502 = vperm.xlu1 %1053, %v1327_v20   ;;  %506 = vperm.xlu0 %1052, %v1324_v19  }
  0xb4   : > { %510 = vperm.xlu1 %1053, %v1335_v22   ;;  %514 = vperm.xlu0 %1052, %v1332_v21  }
  0xb8   : > { %518 = vperm.xlu1 %1053, %v1343_v24   ;;  %522 = vperm.xlu0 %1052, %v1340_v23  }
  0xbc   : > { %526 = vperm.xlu1 %1053, %v1351_v26   ;;  %530 = vperm.xlu0 %1052, %v1348_v25  }
  0xc0   : > { %534 = vperm.xlu1 %1053, %v1359_v28   ;;  %538 = vperm.xlu0 %1052, %v1356_v27  }
  0xc4   : > { %542 = vperm.xlu1 %1053, %v1367_v30   ;;  %546 = vperm.xlu0 %1052, %v1364_v29  }
  0xc8   : > { %550 = vperm.xlu1 %1053, %v1375_v32   ;;  %554 = vperm.xlu0 %1052, %v1372_v31  }
  0xca   : > { %v1411_v34 = vpop.permute.xlu1 %245  ;;  %v1413_v35 = vpop.permute.xlu0 %235 }
  0xcc   : > { %1054 = vset.pattern.permute.xlu1 %v1132_v36  ;;  %1055 = vset.pattern.permute.xlu0 %v1132_v36 }
  0xcd   : > { %626 = vperm.xlu1 %1054, %v1255_v2   ;;  %630 = vperm.xlu0 %1055, %v1263_v4   ;;  %v1498_v2 = vld [vmem:[#allocation2] sm:$0x7] }
  0xce   : > { %v1417_v37 = vpop.permute.xlu1 %250  ;;  %v1419_v38 = vpop.permute.xlu0 %240 }
  0xd1   : > { %634 = vperm.xlu1 %1054, %v1252_v1   ;;  %642 = vperm.xlu0 %1055, %v1271_v6   ;;  %v395_v1 = vsub.s32 0, %v1487_v62 }
  0xd2   : > { %v1423_v39 = vpop.permute.xlu1 %260  ;;  %v1425_v40 = vpop.permute.xlu0 %255 }
  0xd5   : > { %638 = vperm.xlu1 %1054, %v1260_v3   ;;  %650 = vperm.xlu0 %1055, %v1279_v8  }
  0xd6   : > { %v1429_v41 = vpop.permute.xlu1 %270  ;;  %v1431_v42 = vpop.permute.xlu0 %265 }
  0xd9   : > { %646 = vperm.xlu1 %1054, %v1268_v5   ;;  %658 = vperm.xlu0 %1055, %v1287_v10   ;;  %v1505_v5 = vrot.slane %v1498_v2, %v395_v1 }
  0xda   : > { %v1435_v43 = vpop.permute.xlu1 %280  ;;  %v1437_v44 = vpop.permute.xlu0 %275 }
  0xdd   : > { %654 = vperm.xlu1 %1054, %v1276_v7   ;;  %666 = vperm.xlu0 %1055, %v1295_v12  }
  0xde   : > { %v1441_v45 = vpop.permute.xlu1 %290  ;;  %v1443_v46 = vpop.permute.xlu0 %285 }
  0xe1   : > { %662 = vperm.xlu1 %1054, %v1284_v9   ;;  %674 = vperm.xlu0 %1055, %v1303_v14   ;;  %v559_v9 = vsub.s32 1, %v1487_v62 }
  0xe2   : > { %v1447_v47 = vpop.permute.xlu1 %300  ;;  %v1449_v48 = vpop.permute.xlu0 %295 }
  0xe3   : > { %v1522_v12 = vrot.slane %v1498_v2, %v559_v9 }
  0xe5   : > { %670 = vperm.xlu1 %1054, %v1292_v11   ;;  %682 = vperm.xlu0 %1055, %v1311_v16  }
  0xe6   : > { %v1453_v49 = vpop.permute.xlu1 %310  ;;  %v1455_v50 = vpop.permute.xlu0 %305 }
  0xe9   : > { %678 = vperm.xlu1 %1054, %v1300_v13   ;;  %690 = vperm.xlu0 %1055, %v1319_v18  }
  0xea   : > { %v1459_v51 = vpop.permute.xlu1 %320  ;;  %v1461_v52 = vpop.permute.xlu0 %315 }
  0xed   : > { %686 = vperm.xlu1 %1054, %v1308_v15   ;;  %698 = vperm.xlu0 %1055, %v1327_v20   ;;  %v400_v15 = vmul.f32 %v1505_v5, %v1417_v37  ;;  %v402_v20 = vmul.f32 %v1505_v5, %v1423_v39  ;;  %v408_v37 = vmul.f32 %v1505_v5, %v1441_v45 }
  0xee   : > { %v1465_v53 = vpop.permute.xlu1 %330  ;;  %v1467_v54 = vpop.permute.xlu0 %325  ;;  %v412_v45 = vmul.f32 %v1505_v5, %v1453_v49 }
  0xef   : > { %v416_v49 = vmul.f32 %v1505_v5, %v1465_v53 }
  0xf1   : > { %694 = vperm.xlu1 %1054, %v1316_v17   ;;  %706 = vperm.xlu0 %1055, %v1335_v22  }
  0xf2   : > { %v1471_v55 = vpop.permute.xlu1 %340  ;;  %v1473_v56 = vpop.permute.xlu0 %335 }
  0xf5   : > { %702 = vperm.xlu1 %1054, %v1324_v19   ;;  %714 = vperm.xlu0 %1055, %v1343_v24  }
  0xf6   : > { %v1477_v57 = vpop.permute.xlu1 %350  ;;  %v1479_v58 = vpop.permute.xlu0 %345 }
  0xf7   : > { %v420_v53 = vmul.f32 %v1505_v5, %v1477_v57 }
  0xf9   : > { %710 = vperm.xlu1 %1054, %v1332_v21   ;;  %722 = vperm.xlu0 %1055, %v1351_v26  }
  0xfa   : > { %v1483_v60 = vpop.permute.xlu1 %360  ;;  %v1485_v61 = vpop.permute.xlu0 %355 }
  0xfd   : > { %718 = vperm.xlu1 %1054, %v1340_v23   ;;  %730 = vperm.xlu0 %1055, %v1359_v28  }
  0xfe   : > { %v1491_v63 = vpop.permute.xlu1 %370  ;;  %v1493_v0 = vpop.permute.xlu0 %365 }
  0xff   : > { %v424_v57 = vmul.f32 %v1505_v5, %v1491_v63 }
 0x101   : > { %726 = vperm.xlu1 %1054, %v1348_v25   ;;  %738 = vperm.xlu0 %1055, %v1367_v30   ;;  %v404_v25 = vmul.f32 %v1505_v5, %v1429_v41  ;;  %v406_v30 = vmul.f32 %v1505_v5, %v1435_v43  ;;  %v410_v43 = vmul.f32 %v1505_v5, %v1447_v47 }
 0x102   : > { %v1500_v3 = vpop.permute.xlu1 %380  ;;  %v1502_v4 = vpop.permute.xlu0 %375  ;;  %v414_v47 = vmul.f32 %v1505_v5, %v1459_v51  ;;  %v418_v51 = vmul.f32 %v1505_v5, %v1471_v55  ;;  %v422_v55 = vmul.f32 %v1505_v5, %v1483_v60 }
 0x103   : > { %v426_v60 = vmul.f32 %v1505_v5, %v1500_v3 }
 0x105   : > { %734 = vperm.xlu1 %1054, %v1356_v27   ;;  %746 = vperm.xlu0 %1055, %v1375_v32  }
 0x106   : > { %v391_v6 = vpop.permute.xlu1 %390  ;;  %v1509_v7 = vpop.permute.xlu0 %385 }
 0x107   : > { %v1512_v8 = vmul.f32 %v1505_v5, %v391_v6 }
 0x109   : > { %742 = vperm.xlu1 %1054, %v1364_v29  }
 0x10b   : > { %v1516_v10 = vpop.permute.xlu1 %434  ;;  %v1518_v11 = vpop.permute.xlu0 %430 }
 0x10d   : > { %750 = vperm.xlu1 %1054, %v1372_v31  }
 0x10f   : > { %v1524_v13 = vpop.permute.xlu1 %438  ;;  %v443_v14 = vpop.permute.xlu0 %442 }
 0x110   : > { %v564_v16 = vmul.f32 %v1522_v12, %v443_v14 }
 0x112   : > { %v1529_v17 = vadd.f32 %v564_v16, %v400_v15 }
 0x113   : > { %v1531_v18 = vpop.permute.xlu1 %446  ;;  %v451_v19 = vpop.permute.xlu0 %450 }
 0x114   : > { %v566_v21 = vmul.f32 %v1522_v12, %v451_v19 }
 0x116   : > { %v1536_v22 = vadd.f32 %v566_v21, %v402_v20 }
 0x117   : > { %v1538_v23 = vpop.permute.xlu1 %454  ;;  %v459_v24 = vpop.permute.xlu0 %458 }
 0x118   : > { %v568_v26 = vmul.f32 %v1522_v12, %v459_v24 }
 0x11a   : > { %v1543_v27 = vadd.f32 %v568_v26, %v404_v25 }
 0x11b   : > { %v1545_v28 = vpop.permute.xlu1 %462  ;;  %v467_v29 = vpop.permute.xlu0 %466 }
 0x11c   : > { %v570_v31 = vmul.f32 %v1522_v12, %v467_v29 }
 0x11e   : > { %v1550_v32 = vadd.f32 %v570_v31, %v406_v30 }
 0x11f   : > { %v1552_v33 = vpop.permute.xlu1 %470  ;;  %v475_v36 = vpop.permute.xlu0 %474 }
 0x120   : > { %v572_v39 = vmul.f32 %v1522_v12, %v475_v36 }
 0x122   : > { %v1557_v41 = vadd.f32 %v572_v39, %v408_v37 }
 0x123   : > { %v1559_v59 = vpop.permute.xlu1 %478  ;;  %v483_v1 = vpop.permute.xlu0 %482 }
 0x124   : > { %v574_v6 = vmul.f32 %v1522_v12, %v483_v1 }
 0x126   : > { %v1564_v9 = vadd.f32 %v574_v6, %v410_v43 }
 0x127   : > { %v1566_v14 = vpop.permute.xlu1 %486  ;;  %v491_v15 = vpop.permute.xlu0 %490 }
 0x128   : > { %v576_v16 = vmul.f32 %v1522_v12, %v491_v15 }
 0x12a   : > { %v1571_v19 = vadd.f32 %v576_v16, %v412_v45 }
 0x12b   : > { %v1573_v20 = vpop.permute.xlu1 %494  ;;  %v499_v21 = vpop.permute.xlu0 %498 }
 0x12c   : > { %v578_v24 = vmul.f32 %v1522_v12, %v499_v21 }
 0x12e   : > { %v1578_v25 = vadd.f32 %v578_v24, %v414_v47 }
 0x12f   : > { %v1580_v26 = vpop.permute.xlu1 %502  ;;  %v507_v29 = vpop.permute.xlu0 %506 }
 0x130   : > { %v580_v30 = vmul.f32 %v1522_v12, %v507_v29 }
 0x132   : > { %v1585_v31 = vadd.f32 %v580_v30, %v416_v49 }
 0x133   : > { %v1587_v36 = vpop.permute.xlu1 %510  ;;  %v515_v37 = vpop.permute.xlu0 %514 }
 0x134   : > { %v582_v39 = vmul.f32 %v1522_v12, %v515_v37 }
 0x136   : > { %v1592_v1 = vadd.f32 %v582_v39, %v418_v51 }
 0x137   : > { %v1594_v43 = vpop.permute.xlu1 %518  ;;  %v523_v6 = vpop.permute.xlu0 %522 }
 0x138   : > { %v584_v15 = vmul.f32 %v1522_v12, %v523_v6 }
 0x13a   : > { %v1599_v45 = vadd.f32 %v584_v15, %v420_v53  ;;  %v755_v53 = vsub.s32 2, %v1487_v62  ;;  %v397_v62 = vmul.f32 %v1505_v5, %v1413_v35  ;;  %v399_v35 = vmul.f32 %v1505_v5, %v1411_v34 }
 0x13b   : > { %v1601_v16 = vpop.permute.xlu1 %526  ;;  %v531_v21 = vpop.permute.xlu0 %530 }
 0x13c   : > { %v586_v47 = vmul.f32 %v1522_v12, %v531_v21 }
 0x13e   : > { %v1606_v24 = vadd.f32 %v586_v47, %v422_v55  ;;  %v562_v47 = vmul.f32 %v1522_v12, %v1516_v10  ;;  %v565_v10 = vmul.f32 %v1522_v12, %v1531_v18 }
 0x13f   : > { %v1608_v29 = vpop.permute.xlu1 %534  ;;  %v539_v49 = vpop.permute.xlu0 %538 }
 0x140   : > { %v588_v30 = vmul.f32 %v1522_v12, %v539_v49  ;;  %v561_v49 = vmul.f32 %v1522_v12, %v1518_v11 }
 0x142   : > { %v1613_v37 = vadd.f32 %v588_v30, %v424_v57  ;;  %v1631_v57 = vrot.slane %v1498_v2, %v755_v53  ;;  %v398_v30 = vmul.f32 %v1505_v5, %v1419_v38  ;;  %v593_v2 = vadd.f32 %v561_v49, %v397_v62 }
 0x143   : > { %v1615_v51 = vpop.permute.xlu1 %542  ;;  %v547_v39 = vpop.permute.xlu0 %546  ;;  %v401_v38 = vmul.f32 %v1505_v5, %v1425_v40  ;;  %v403_v40 = vmul.f32 %v1505_v5, %v1431_v42 }
 0x144   : > { %v590_v6 = vmul.f32 %v1522_v12, %v547_v39  ;;  %v563_v39 = vmul.f32 %v1522_v12, %v1524_v13 }
 0x146   : > { %v1621_v15 = vadd.f32 %v590_v6, %v426_v60  ;;  %v594_v6 = vadd.f32 %v562_v47, %v398_v30  ;;  %v595_v18 = vadd.f32 %v563_v39, %v399_v35  ;;  %v567_v47 = vmul.f32 %v1522_v12, %v1538_v23 }
 0x147   : > { %v1623_v21 = vpop.permute.xlu1 %550  ;;  %v555_v55 = vpop.permute.xlu0 %554 }
 0x148   : > { %v592_v63 = vmul.f32 %v1522_v12, %v555_v55  ;;  %v1650_v55 = vld [vmem:[#allocation4] ss:$0 sm:$0xff] }
 0x14a   : > { %v1634_v3 = vadd.f32 %v592_v63, %v1512_v8 }
 0x14c   : > { %1835 = vst [vmem:[#allocation8_spill] sm:$0xff] %v1634_v3  ;;  %v627_v60 = vpop.permute.xlu1 %626  ;;  %v631_v11 = vpop.permute.xlu0 %630  ;;  %v597_v3 = vadd.f32 %v565_v10, %v401_v38 }
 0x14d   : > { %v757_v53 = vmul.f32 %v1631_v57, %v627_v60  ;;  %v758_v8 = vmul.f32 %v1631_v57, %v631_v11 }
 0x14f   : > { %v789_v13 = vadd.f32 %v757_v53, %v593_v2  ;;  %v790_v63 = vadd.f32 %v758_v8, %v594_v6  ;;  %v599_v2 = vadd.f32 %v567_v47, %v403_v40  ;;  %v569_v53 = vmul.f32 %v1522_v12, %v1545_v28 }
 0x150   : > { %v635_v49 = vpop.permute.xlu1 %634  ;;  %v643_v62 = vpop.permute.xlu0 %642 }
 0x151   : > { %v828_v30 = vadd.f32 %v1650_v55, %v789_v13  ;;  %v829_v60 = vadd.f32 %v1650_v55, %v790_v63  ;;  %v759_v34 = vmul.f32 %v1631_v57, %v635_v49  ;;  %v761_v11 = vmul.f32 %v1631_v57, %v643_v62 }
 0x153   : > { %v860_v23 = vmax.f32 %v828_v30, 0.0  ;;  %v861_v39 = vmax.f32 %v829_v60, 0.0  ;;  %v791_v10 = vadd.f32 %v759_v34, %v595_v18  ;;  %v793_v6 = vadd.f32 %v761_v11, %v597_v3 }
 0x154   : > { %v639_v8 = vpop.permute.xlu1 %638  ;;  %v651_v35 = vpop.permute.xlu0 %650  ;;  %v405_v3 = vmul.f32 %v1505_v5, %v1437_v44  ;;  %v571_v30 = vmul.f32 %v1522_v12, %v1552_v33 }
 0x155   : > { %892 = vst [vmem:[%s1663_s23] sm:$0xff] %v860_v23  ;;  %893 = vst [vmem:[%s1663_s23 + $0x8] sm:$0xff] %v861_v39  ;;  %v830_v38 = vadd.f32 %v1650_v55, %v791_v10  ;;  %v832_v13 = vadd.f32 %v1650_v55, %v793_v6  ;;  %v760_v42 = vmul.f32 %v1631_v57, %v639_v8 }
 0x156   : > { %v763_v63 = vmul.f32 %v1631_v57, %v651_v35  ;;  %v601_v62 = vadd.f32 %v569_v53, %v405_v3  ;;  %v573_v53 = vmul.f32 %v1522_v12, %v1559_v59 }
 0x157   : > { %v862_v18 = vmax.f32 %v830_v38, 0.0  ;;  %v864_v47 = vmax.f32 %v832_v13, 0.0  ;;  %v792_v28 = vadd.f32 %v760_v42, %v1529_v17  ;;  %v407_v17 = vmul.f32 %v1505_v5, %v1443_v46 }
 0x158   : > { %v795_v49 = vadd.f32 %v763_v63, %v599_v2  ;;  %v647_v60 = vpop.permute.xlu1 %646  ;;  %v659_v34 = vpop.permute.xlu0 %658 }
 0x159   : > { %894 = vst [vmem:[%s1663_s23 + $0x10] sm:$0xff] %v862_v18  ;;  %896 = vst [vmem:[%s1663_s23 + $0x20] sm:$0xff] %v864_v47  ;;  %v831_v11 = vadd.f32 %v1650_v55, %v792_v28  ;;  %v762_v44 = vmul.f32 %v1631_v57, %v647_v60  ;;  %v765_v23 = vmul.f32 %v1631_v57, %v659_v34 }
 0x15a   : > { %v834_v40 = vadd.f32 %v1650_v55, %v795_v49  ;;  %v603_v2 = vadd.f32 %v571_v30, %v407_v17  ;;  %v575_v28 = vmul.f32 %v1522_v12, %v1566_v14  ;;  %v577_v17 = vmul.f32 %v1522_v12, %v1573_v20 }
 0x15b   : > { %v863_v39 = vmax.f32 %v831_v11, 0.0  ;;  %v794_v33 = vadd.f32 %v762_v44, %v1536_v22  ;;  %v797_v6 = vadd.f32 %v765_v23, %v601_v62  ;;  %v409_v22 = vmul.f32 %v1505_v5, %v1449_v48 }
 0x15c   : > { %v866_v10 = vmax.f32 %v834_v40, 0.0  ;;  %v655_v8 = vpop.permute.xlu1 %654  ;;  %v667_v35 = vpop.permute.xlu0 %666 }
 0x15d   : > { %895 = vst [vmem:[%s1663_s23 + $0x18] sm:$0xff] %v863_v39  ;;  %v833_v38 = vadd.f32 %v1650_v55, %v794_v33  ;;  %v836_v13 = vadd.f32 %v1650_v55, %v797_v6  ;;  %v764_v46 = vmul.f32 %v1631_v57, %v655_v8  ;;  %v767_v42 = vmul.f32 %v1631_v57, %v667_v35 }
 0x15e   : > { %898 = vst [vmem:[%s1663_s23 + $0x30] sm:$0xff] %v866_v10  ;;  %v605_v47 = vadd.f32 %v573_v53, %v409_v22 }
 0x15f   : > { %v865_v63 = vmax.f32 %v833_v38, 0.0  ;;  %v868_v3 = vmax.f32 %v836_v13, 0.0  ;;  %v796_v59 = vadd.f32 %v764_v46, %v1543_v27  ;;  %v799_v18 = vadd.f32 %v767_v42, %v603_v2 }
 0x160   : > { %v663_v49 = vpop.permute.xlu1 %662  ;;  %v675_v62 = vpop.permute.xlu0 %674  ;;  %v411_v27 = vmul.f32 %v1505_v5, %v1455_v50  ;;  %v579_v13 = vmul.f32 %v1522_v12, %v1580_v26 }
 0x161   : > { %897 = vst [vmem:[%s1663_s23 + $0x28] sm:$0xff] %v865_v63  ;;  %900 = vst [vmem:[%s1663_s23 + $0x40] sm:$0xff] %v868_v3  ;;  %v835_v30 = vadd.f32 %v1650_v55, %v796_v59  ;;  %v838_v60 = vadd.f32 %v1650_v55, %v799_v18  ;;  %v766_v48 = vmul.f32 %v1631_v57, %v663_v49 }
 0x162   : > { %v769_v34 = vmul.f32 %v1631_v57, %v675_v62  ;;  %v607_v23 = vadd.f32 %v575_v28, %v411_v27  ;;  %v581_v49 = vmul.f32 %v1522_v12, %v1587_v36 }
 0x163   : > { %v867_v11 = vmax.f32 %v835_v30, 0.0  ;;  %v870_v40 = vmax.f32 %v838_v60, 0.0  ;;  %v798_v14 = vadd.f32 %v766_v48, %v1550_v32  ;;  %v413_v32 = vmul.f32 %v1505_v5, %v1461_v52 }
 0x164   : > { %v801_v44 = vadd.f32 %v769_v34, %v605_v47  ;;  %v671_v39 = vpop.permute.xlu1 %670  ;;  %v683_v10 = vpop.permute.xlu0 %682 }
 0x165   : > { %899 = vst [vmem:[%s1663_s23 + $0x38] sm:$0xff] %v867_v11  ;;  %902 = vst [vmem:[%s1663_s23 + $0x50] sm:$0xff] %v870_v40  ;;  %v837_v33 = vadd.f32 %v1650_v55, %v798_v14  ;;  %v768_v50 = vmul.f32 %v1631_v57, %v671_v39  ;;  %v771_v2 = vmul.f32 %v1631_v57, %v683_v10 }
 0x166   : > { %v840_v6 = vadd.f32 %v1650_v55, %v801_v44  ;;  %v609_v38 = vadd.f32 %v577_v17, %v413_v32  ;;  %v583_v44 = vmul.f32 %v1522_v12, %v1594_v43 }
 0x167   : > { %v869_v53 = vmax.f32 %v837_v33, 0.0  ;;  %v800_v20 = vadd.f32 %v768_v50, %v1557_v41  ;;  %v803_v35 = vadd.f32 %v771_v2, %v607_v23  ;;  %v415_v41 = vmul.f32 %v1505_v5, %v1467_v54 }
 0x168   : > { %v872_v8 = vmax.f32 %v840_v6, 0.0  ;;  %v679_v46 = vpop.permute.xlu1 %678  ;;  %v691_v42 = vpop.permute.xlu0 %690 }
 0x169   : > { %901 = vst [vmem:[%s1663_s23 + $0x48] sm:$0xff] %v869_v53  ;;  %v839_v22 = vadd.f32 %v1650_v55, %v800_v20  ;;  %v842_v63 = vadd.f32 %v1650_v55, %v803_v35  ;;  %v770_v52 = vmul.f32 %v1631_v57, %v679_v46  ;;  %v773_v3 = vmul.f32 %v1631_v57, %v691_v42 }
 0x16a   : > { %904 = vst [vmem:[%s1663_s23 + $0x60] sm:$0xff] %v872_v8  ;;  %v611_v28 = vadd.f32 %v579_v13, %v415_v41  ;;  %v585_v53 = vmul.f32 %v1522_v12, %v1601_v16 }
 0x16b   : > { %v871_v59 = vmax.f32 %v839_v22, 0.0  ;;  %v874_v18 = vmax.f32 %v842_v63, 0.0  ;;  %v802_v26 = vadd.f32 %v770_v52, %v1564_v9  ;;  %v805_v47 = vadd.f32 %v773_v3, %v609_v38 }
 0x16c   : > { %v687_v62 = vpop.permute.xlu1 %686  ;;  %v699_v30 = vpop.permute.xlu0 %698  ;;  %v417_v9 = vmul.f32 %v1505_v5, %v1473_v56  ;;  %v587_v52 = vmul.f32 %v1522_v12, %v1608_v29 }
 0x16d   : > { %903 = vst [vmem:[%s1663_s23 + $0x58] sm:$0xff] %v871_v59  ;;  %906 = vst [vmem:[%s1663_s23 + $0x70] sm:$0xff] %v874_v18  ;;  %v841_v60 = vadd.f32 %v1650_v55, %v802_v26  ;;  %v844_v48 = vadd.f32 %v1650_v55, %v805_v47  ;;  %v772_v54 = vmul.f32 %v1631_v57, %v687_v62 }
 0x16e   : > { %v775_v34 = vmul.f32 %v1631_v57, %v699_v30  ;;  %v613_v14 = vadd.f32 %v581_v49, %v417_v9  ;;  %v589_v30 = vmul.f32 %v1522_v12, %v1615_v51 }
 0x16f   : > { %v873_v27 = vmax.f32 %v841_v60, 0.0  ;;  %v876_v11 = vmax.f32 %v844_v48, 0.0  ;;  %v804_v36 = vadd.f32 %v772_v54, %v1571_v19  ;;  %v419_v19 = vmul.f32 %v1505_v5, %v1479_v58 }
 0x170   : > { %v807_v40 = vadd.f32 %v775_v34, %v611_v28  ;;  %v695_v23 = vpop.permute.xlu1 %694  ;;  %v707_v17 = vpop.permute.xlu0 %706 }
 0x171   : > { %905 = vst [vmem:[%s1663_s23 + $0x68] sm:$0xff] %v873_v27  ;;  %908 = vst [vmem:[%s1663_s23 + $0x80] sm:$0xff] %v876_v11  ;;  %v843_v39 = vadd.f32 %v1650_v55, %v804_v36  ;;  %v774_v56 = vmul.f32 %v1631_v57, %v695_v23  ;;  %v777_v33 = vmul.f32 %v1631_v57, %v707_v17 }
 0x172   : > { %v846_v10 = vadd.f32 %v1650_v55, %v807_v40  ;;  %v615_v32 = vadd.f32 %v583_v44, %v419_v19 }
 0x173   : > { %v875_v6 = vmax.f32 %v843_v39, 0.0  ;;  %v806_v43 = vadd.f32 %v774_v56, %v1578_v25  ;;  %v809_v2 = vadd.f32 %v777_v33, %v613_v14  ;;  %v421_v25 = vmul.f32 %v1505_v5, %v1485_v61 }
 0x174   : > { %v878_v50 = vmax.f32 %v846_v10, 0.0  ;;  %v703_v8 = vpop.permute.xlu1 %702  ;;  %v715_v20 = vpop.permute.xlu0 %714  ;;  %v591_v14 = vmul.f32 %v1522_v12, %v1623_v21 }
 0x175   : > { %907 = vst [vmem:[%s1663_s23 + $0x78] sm:$0xff] %v875_v6  ;;  %v845_v35 = vadd.f32 %v1650_v55, %v806_v43  ;;  %v848_v38 = vadd.f32 %v1650_v55, %v809_v2  ;;  %v776_v58 = vmul.f32 %v1631_v57, %v703_v8  ;;  %v779_v13 = vmul.f32 %v1631_v57, %v715_v20 }
 0x176   : > { %910 = vst [vmem:[%s1663_s23 + $0x90] sm:$0xff] %v878_v50  ;;  %v617_v63 = vadd.f32 %v585_v53, %v421_v25 }
 0x177   : > { %v877_v46 = vmax.f32 %v845_v35, 0.0  ;;  %v880_v42 = vmax.f32 %v848_v38, 0.0  ;;  %v808_v16 = vadd.f32 %v776_v58, %v1585_v31  ;;  %v811_v22 = vadd.f32 %v779_v13, %v615_v32 }
 0x178   : > { %v711_v3 = vpop.permute.xlu1 %710  ;;  %v723_v41 = vpop.permute.xlu0 %722  ;;  %v423_v31 = vmul.f32 %v1505_v5, %v1493_v0 }
 0x179   : > { %909 = vst [vmem:[%s1663_s23 + $0x88] sm:$0xff] %v877_v46  ;;  %912 = vst [vmem:[%s1663_s23 + $0xa0] sm:$0xff] %v880_v42  ;;  %v847_v59 = vadd.f32 %v1650_v55, %v808_v16  ;;  %v850_v18 = vadd.f32 %v1650_v55, %v811_v22  ;;  %v778_v61 = vmul.f32 %v1631_v57, %v711_v3 }
 0x17a   : > { %v781_v26 = vmul.f32 %v1631_v57, %v723_v41  ;;  %v619_v62 = vadd.f32 %v587_v52, %v423_v31 }
 0x17b   : > { %v879_v47 = vmax.f32 %v847_v59, 0.0  ;;  %v882_v28 = vmax.f32 %v850_v18, 0.0  ;;  %v810_v29 = vadd.f32 %v778_v61, %v1592_v1  ;;  %v425_v1 = vmul.f32 %v1505_v5, %v1502_v4 }
 0x17c   : > { %v813_v49 = vadd.f32 %v781_v26, %v617_v63  ;;  %v719_v60 = vpop.permute.xlu1 %718  ;;  %v731_v48 = vpop.permute.xlu0 %730  ;;  %v1836_v63 = vld [vmem:[#allocation8_spill] sm:$0xff] }
 0x17d   : > { %911 = vst [vmem:[%s1663_s23 + $0x98] sm:$0xff] %v879_v47  ;;  %914 = vst [vmem:[%s1663_s23 + $0xb0] sm:$0xff] %v882_v28  ;;  %v849_v54 = vadd.f32 %v1650_v55, %v810_v29  ;;  %v780_v0 = vmul.f32 %v1631_v57, %v719_v60  ;;  %v783_v9 = vmul.f32 %v1631_v57, %v731_v48 }
 0x17e   : > { %v852_v34 = vadd.f32 %v1650_v55, %v813_v49  ;;  %v621_v40 = vadd.f32 %v589_v30, %v425_v1 }
 0x17f   : > { %v881_v27 = vmax.f32 %v849_v54, 0.0  ;;  %v812_v51 = vadd.f32 %v780_v0, %v1599_v45  ;;  %v815_v36 = vadd.f32 %v783_v9, %v619_v62  ;;  %v427_v45 = vmul.f32 %v1505_v5, %v1509_v7 }
 0x180   : > { %v884_v11 = vmax.f32 %v852_v34, 0.0  ;;  %v727_v44 = vpop.permute.xlu1 %726  ;;  %v739_v23 = vpop.permute.xlu0 %738 }
 0x181   : > { %913 = vst [vmem:[%s1663_s23 + $0xa8] sm:$0xff] %v881_v27  ;;  %v851_v17 = vadd.f32 %v1650_v55, %v812_v51  ;;  %v854_v39 = vadd.f32 %v1650_v55, %v815_v36  ;;  %v782_v4 = vmul.f32 %v1631_v57, %v727_v44  ;;  %v785_v10 = vmul.f32 %v1631_v57, %v739_v23 }
 0x182   : > { %916 = vst [vmem:[%s1663_s23 + $0xc0] sm:$0xff] %v884_v11  ;;  %v623_v19 = vadd.f32 %v591_v14, %v427_v45 }
 0x183   : > { %v883_v56 = vmax.f32 %v851_v17, 0.0  ;;  %v886_v33 = vmax.f32 %v854_v39, 0.0  ;;  %v814_v12 = vadd.f32 %v782_v4, %v1606_v24  ;;  %v817_v21 = vadd.f32 %v785_v10, %v621_v40 }
 0x184   : > { %v735_v6 = vpop.permute.xlu1 %734  ;;  %v747_v50 = vpop.permute.xlu0 %746 }
 0x185   : > { %915 = vst [vmem:[%s1663_s23 + $0xb8] sm:$0xff] %v883_v56  ;;  %918 = vst [vmem:[%s1663_s23 + $0xd0] sm:$0xff] %v886_v33  ;;  %v853_v43 = vadd.f32 %v1650_v55, %v814_v12  ;;  %v856_v2 = vadd.f32 %v1650_v55, %v817_v21  ;;  %v784_v32 = vmul.f32 %v1631_v57, %v735_v6 }
 0x186   : > { %v787_v5 = vmul.f32 %v1631_v57, %v747_v50 }
 0x187   : > { %v885_v7 = vmax.f32 %v853_v43, 0.0  ;;  %v888_v24 = vmax.f32 %v856_v2, 0.0  ;;  %v816_v53 = vadd.f32 %v784_v32, %v1613_v37 }
 0x188   : > { %v819_v8 = vadd.f32 %v787_v5, %v623_v19  ;;  %v743_v20 = vpop.permute.xlu1 %742 }
 0x189   : > { %917 = vst [vmem:[%s1663_s23 + $0xc8] sm:$0xff] %v885_v7  ;;  %920 = vst [vmem:[%s1663_s23 + $0xe0] sm:$0xff] %v888_v24  ;;  %v855_v35 = vadd.f32 %v1650_v55, %v816_v53  ;;  %v786_v58 = vmul.f32 %v1631_v57, %v743_v20 }
 0x18a   : > { %v858_v38 = vadd.f32 %v1650_v55, %v819_v8 }
 0x18b   : > { %v887_v13 = vmax.f32 %v855_v35, 0.0  ;;  %v818_v46 = vadd.f32 %v786_v58, %v1621_v15 }
 0x18c   : > { %v890_v25 = vmax.f32 %v858_v38, 0.0  ;;  %v751_v42 = vpop.permute.xlu1 %750 }
 0x18d   : > { %919 = vst [vmem:[%s1663_s23 + $0xd8] sm:$0xff] %v887_v13  ;;  %v857_v37 = vadd.f32 %v1650_v55, %v818_v46  ;;  %v788_v16 = vmul.f32 %v1631_v57, %v751_v42 }
 0x18e   : > { %922 = vst [vmem:[%s1663_s23 + $0xf0] sm:$0xff] %v890_v25 }
 0x18f   : > { %v889_v22 = vmax.f32 %v857_v37, 0.0  ;;  %v820_v52 = vadd.f32 %v788_v16, %v1836_v63 }
 0x191   : > { %921 = vst [vmem:[%s1663_s23 + $0xe8] sm:$0xff] %v889_v22  ;;  %v859_v3 = vadd.f32 %v1650_v55, %v820_v52 }
 0x193   : > { %v891_v41 = vmax.f32 %v859_v3, 0.0 }
 0x195   : > { %923 = vst [vmem:[%s1663_s23 + $0xf8] sm:$0xff] %v891_v41 }
 0x196 PF: > { %s15_s12 = sadd.s32 1, %s1126_s12  }
 0x197   : > { %p12_p8 = scmp.ge.s32.totalorder %s15_s12, 4  }
 0x199   :  { %14 = sbr.rel (!%p12_p8) target bundleno = 2 (0x2), region = 71 }
 0x1a0   :  { %946 = vsyncpa [#allocation3], 1 }
 0x1a1   :  { %948 = vsyncpa [#allocation3 + $0x1], 1 }
 0x1a2   :  { %949 = vsyncpa [#allocation5], 1 }

// kernel: model_forward.3
= control target key start
LH: loop header
LB: loop body
LE: loop exit
PB: predicated region body
PF: predicated region fallthrough
CT: control target
= control target key end

     0   :  { %10 = vsyncpa [#allocation4], 0  ;;  %s2866_s0 = inlined_call_operand.vmem [shape: f32[2,32768], index: 0, kind: input, shape index: {}]   ;;  %s2867_s1 = inlined_call_operand.hbm [shape: f32[32768,128], index: 1, kind: input, shape index: {}]   ;;  %s2868_s2 = inlined_call_operand.hbm [shape: f32[1,128], index: 2, kind: input, shape index: {}]   ;;  %s2869_s3 = inlined_call_operand.vmem [shape: f32[128,10], index: 3, kind: input, shape index: {}]   ;;  %s2870_s4 = inlined_call_operand.hbm [shape: f32[1,10], index: 4, kind: input, shape index: {}]   ;;  %s2871_s5 = inlined_call_operand.hbm [shape: f32[2,10], index: 5, kind: output, shape index: {}]  }
   0x1   :  { %12 = vsyncpa [#allocation4 + $0x1], 0 }
   0x2   :  { %13 = vsyncpa [#allocation7], 0 }
   0x3   :  { %14 = vsyncpa [#allocation5], 0  ;;  %s2302_s18 = smov 0   ;;  %s2304_s19 = smov 0  }
   0x4   :  { %s2306_s20 = smov 0   ;;  %s2308_s21 = smov 0  }
   0x5 LB: > { %s2321_s22 = sadd.s32 4294967295, %s2259_s21   ;;  %s2324_s23 = sadd.s32 1, %s2259_s21   ;;  %s2259_s21 = sphi %s2308_s21, %s2890_s21   ;;  %s2255_s20 = sphi %s2306_s20, %s2889_s20   ;;  %s2251_s19 = sphi %s2304_s19, %s2888_s19   ;;  %s2247_s18 = sphi %s2302_s18, %s2887_s18  }
   0x6   : > { %s50_s24 = ssub.s32 %s2259_s21, %s2324_s23  ;;  %s53_s25 = sadd.s32 1, %s2255_s20 }
   0x7   : > { %p51_p0 = scmp.eq.s32.totalorder %s50_s24, 0  ;;  %p60_p1 = scmp.ne.s32.totalorder %s2255_s20, %s2251_s19 }
   0x8   : > { %p61_p2 = scmp.eq.s32.totalorder %s2259_s21, 0  ;;  %p66_p3 = scmp.ne.s32.totalorder %s2251_s19, %s2247_s18 }
   0x9   : > { %s2334_s26 = scalar_select %p51_p0, %s2255_s20, %s53_s25  }
   0xa   : > { %p2336_p4 = por %p61_p2, %p60_p1  ;;  %p2872_p5 = scmp.eq.s32.totalorder %s2321_s22, 0 }
   0xb   : > { %p1393_p6 = scmp.ge.s32.totalorder %s2259_s21, 1  ;;  %p161_p7 = scmp.lt.s32.totalorder %s2259_s21, 17 }
   0xc   : > { %p2345_p8 = por %p2872_p5, %p66_p3  ;;  %s2261_s30 = smov [#allocation6]  }
   0xd   : > { %p2350_p10 = pnand %p1393_p6, %p161_p7  ;;  %s174_s6 = sshll.u32 %s2261_s30, 4  ;;  %s175_s6 = int_to_ptr.vmem [resolvable:$true] %s174_s6 }
   0xe   : > { %s2877_s28 = scalar_select %p2345_p8, 1, 0 }
   0xf   : > { %s2878_s29 = scalar_select %p2350_p10, 1, 0 }
  0x10   : > { %p2041_p11 = pneg %p2350_p10  ;;  %p2054_p12 = scmp.lt.s32.totalorder %s2259_s21, 16 }
  0x11   : > { %s2262_s8 = smov [#allocation8]   ;;  %s208_s11 = sand.u32 1, %s2255_s20  }
  0x12   : > { %p2359_p13 = pnand %p2041_p11, %p2872_p5  ;;  %s188_s9 = sshll.u32 %s2262_s8, 4  ;;  %s2369_s9 = int_to_ptr.vmem [resolvable:$true] %s188_s9 }
  0x13   : > { %p2365_p0 = pnand %p2054_p12, %p2336_p4  ;;  %s2105_s14 = scalar_lea.hbm %s2868_s2, 16 }
  0x14   : > { %p2106_p1 = scmp.ne.s32.totalorder %s2868_s2, %s2105_s14  ;;  %p2107_p2 = pneg %p2359_p13 }
  0x15   : > { %s2880_s10 = scalar_select %p2365_p0, 1, 0 }
  0x16   : > { %p2108_p3 = pnand %p2107_p2, %p2106_p1  ;;  %p2112_p6 = scmp.lt.u32.totalorder %s2105_s14, %s2868_s2 }
  0x18   : > { %p2109_p4 = pneg %p2108_p3 }
  0x1a   : > { %p2114_p7 = pnand %p2112_p6, %p2109_p4 }
  0x1c   : > { %2117 = shalt.err (!%p2114_p7)
}
  0x1d   : > { %s2118_s24 = scalar_lea.vmem %s175_s6, 16  ;;  %s2125_s25 = scalar_lea.vmem %s175_s6, 32 }
  0x1e   : > { %p2119_p11 = scmp.ne.s32.totalorder %s175_s6, %s2118_s24  ;;  %p2126_p5 = scmp.lt.s32.totalorder %s175_s6, %s175_s6 }
  0x1f   : > { %p2127_p8 = scmp.lt.s32.totalorder %s2125_s25, %s2118_s24 }
  0x20   : > { %p2121_p12 = pnand %p2119_p11, %p2107_p2 }
  0x21   : > { %p2128_p10 = por %p2127_p8, %p2126_p5 }
  0x22   : > { %p2122_p9 = pneg %p2121_p12 }
  0x24   : > { %p2129_p0 = pnand %p2128_p10, %p2122_p9 }
  0x26   : > { %2132 = shalt.err (!%p2129_p0)
}
  0x27   : > { %2044 = dma.hbm_to_vmem [thread:$0]  (!%p2359_p13), %s2868_s2, 16, %s175_s6, [#allocation7]  }
  0x28   : > { %s2133_s13 = scalar_lea.hbm %s2870_s4, 16 }
  0x29   : > { %p2134_p1 = scmp.ne.s32.totalorder %s2870_s4, %s2133_s13  ;;  %p2140_p9 = scmp.lt.u32.totalorder %s2133_s13, %s2870_s4 }
  0x2b   : > { %p2136_p5 = pnand %p2134_p1, %p2107_p2 }
  0x2d   : > { %p2137_p8 = pneg %p2136_p5 }
  0x2f   : > { %p2142_p10 = pnand %p2140_p9, %p2137_p8 }
  0x31   : > { %2145 = shalt.err (!%p2142_p10)
}
  0x32   : > { %s2146_s6 = scalar_lea.vmem %s2369_s9, 16  ;;  %s2153_s18 = scalar_lea.vmem %s2369_s9, 32 }
  0x33   : > { %p2147_p0 = scmp.ne.s32.totalorder %s2369_s9, %s2146_s6  ;;  %p2154_p6 = scmp.lt.s32.totalorder %s2369_s9, %s2369_s9 }
  0x34   : > { %p2155_p7 = scmp.lt.s32.totalorder %s2153_s18, %s2146_s6 }
  0x35   : > { %p2149_p3 = pnand %p2147_p0, %p2107_p2 }
  0x36   : > { %p2156_p11 = por %p2155_p7, %p2154_p6 }
  0x37   : > { %p2150_p4 = pneg %p2149_p3 }
  0x39   : > { %p2157_p12 = pnand %p2156_p11, %p2150_p4 }
  0x3b   : > { %2160 = shalt.err (!%p2157_p12)
}
  0x3c   : > { %2047 = dma.hbm_to_vmem [thread:$0]  (!%p2359_p13), %s2870_s4, 16, %s2369_s9, [#allocation7]  }
  0x3d   : > { %s1397_s27 = sshll.u32 %s208_s11, 11  ;;  %s1414_s30 = sshll.u32 %s2259_s21, 15 }
  0x3e   : > { %s2426_s13 = scalar_lea.hbm %s2867_s1, %s1414_s30  ;;  %s212_s7 = scalar_lea.vmem [#allocation3], %s1397_s27 }
  0x3f   : > { %s219_s14 = sshll.u32 %s212_s7, 4  ;;  %s2432_s15 = scalar_lea.sflag [#allocation4], %s208_s11  ;;  %s2428_s14 = int_to_ptr.vmem [resolvable:$true] %s219_s14 }
  0x40   : > { %s2161_s9 = scalar_lea.hbm %s2426_s13, 32768  ;;  %p2881_p2 = scmp.ne.s32.totalorder %s2880_s10, 0 }
  0x41   : > { %p2162_p13 = scmp.ne.s32.totalorder %s2426_s13, %s2161_s9  ;;  %s2166_s17 = scalar_lea.hbm %s2867_s1, 524288 }
  0x42   : > { %p2163_p1 = pneg %p2881_p2  ;;  %p2167_p9 = scmp.lt.u32.totalorder %s2426_s13, %s2867_s1 }
  0x43   : > { %p2168_p10 = scmp.lt.u32.totalorder %s2166_s17, %s2161_s9  ;;  %p2170_p3 = scmp.lt.u32.totalorder %s2161_s9, %s2426_s13 }
  0x44   : > { %p2164_p5 = pnand %p2163_p1, %p2162_p13 }
  0x45   : > { %p2169_p0 = por %p2168_p10, %p2167_p9 }
  0x46   : > { %p2165_p8 = pneg %p2164_p5 }
  0x47   : > { %p2171_p4 = por %p2170_p3, %p2169_p0 }
  0x49   : > { %p2172_p6 = pnand %p2171_p4, %p2165_p8 }
  0x4b   : > { %2175 = shalt.err (!%p2172_p6)
}
  0x4c   : > { %s2176_s11 = scalar_lea.vmem %s2428_s14, 32768  ;;  %s2263_s24 = smov [#allocation3]  }
  0x4d   : > { %p2177_p7 = scmp.ne.s32.totalorder %s2428_s14, %s2176_s11  ;;  %s2181_s25 = sshll.u32 %s2263_s24, 4  ;;  %s2182_s25 = int_to_ptr.vmem [resolvable:$false] %s2181_s25 }
  0x4e   : > { %s2183_s27 = scalar_lea.vmem %s2182_s25, 65536  ;;  %p2184_p13 = scmp.lt.s32.totalorder %s2428_s14, %s2182_s25 }
  0x4f   : > { %p2179_p11 = pnand %p2177_p7, %p2163_p1  ;;  %p2185_p5 = scmp.lt.s32.totalorder %s2183_s27, %s2176_s11 }
  0x51   : > { %p2180_p12 = pneg %p2179_p11  ;;  %p2186_p9 = por %p2185_p5, %p2184_p13 }
  0x53   : > { %p2187_p10 = pnand %p2186_p9, %p2180_p12 }
  0x55   : > { %2190 = shalt.err (!%p2187_p10)
}
  0x56   : > { %s2264_s30 = smov 128   ;;  %s2265_s8 = smov 8  }
  0x57   : > { %2051 = dma.hbm_to_vmem [thread:$0]  (!%p2881_p2), %s2426_s13, 32768, %s2428_s14, %s2432_s15, %s2264_s30, %s2264_s30, %s2265_s8  }
  0x58   : > { %p2882_p1 = scmp.ne.s32.totalorder %s2878_s29, 0 }
  0x59   : > { %s233_s12 = sand.u32 (!%p2882_p1), 1, %s2251_s19   ;;  %p2883_p8 = scmp.ne.s32.totalorder (!%p2882_p1), %s2877_s28, 0 }
  0x5a   : > { %231 = sbr.rel (%p2882_p1) target bundleno = 715 (0x2cb), region = 40  ;;  %s1401_s7 = sshll.u32 (!%p2882_p1), %s233_s12, 11 }
  0x5b   : > { %s234_s9 = scalar_lea.sflag (!%p2882_p1), [#allocation4], %s233_s12  ;;  %s2463_s21 = scalar_lea.vmem (!%p2882_p1), [#allocation3], %s1401_s7 }
  0x61   : > { %2234 = dma.done.wait (%p2883_p8), %s234_s9, 32768  }
  0x62   : > { %2236 = vsyncadd (%p2883_p8), %s234_s9, 4294934528  ;;  %p2884_p0 = scmp.eq.s32.totalorder %s2321_s22, 0 }
  0x64   : > { %2238 = dma.done.wait (%p2884_p0), [#allocation7], 32   ;;  %p2885_p2 = pmov %p2884_p0 }
  0x65   : > { %s1404_s29 = sshll.u32 %s2321_s22, 4  ;;  %p2886_p4 = scmp.ne.s32.totalorder %s2321_s22, 0 }
  0x66   : > { %2240 = vsyncadd (%p2885_p2), [#allocation7], 4294967264  ;;  %p273_p3 = scmp.lt.s32.totalorder %s1404_s29, 255  ;;  %v2266_v0 = vmov (!%p2886_p4), 0.0  }
  0x67   : > { %282 = sbr.rel (%p2886_p4) target bundleno = 110 (0x6e), region = 56  ;;  %283 = vst [vmem:[#allocation2] sm:$0x3] (!%p2886_p4), %v2266_v0 }
  0x68   : > { %s2892_s29 = smov (!%p273_p3, %s1404_s29), 255 }
  0x69   : > { %s1405_s10 = sshll.u32 %s2892_s29, 1 }
  0x6a   : > { %s2477_s15 = scalar_lea.vmem %s2866_s0, %s1405_s10 }
  0x6e PF: > { %v305_v1 = vld [vmem:[%s2463_s21 + $0x80] sm:$0xff]  ;;  %v306_v2 = vld [vmem:[%s2463_s21 + $0x88] sm:$0xff]  ;;  %v307_v12 = vld [vmem:[%s2463_s21 + $0x90] sm:$0xff]  ;;  %v2267_v48 = vmov 1983009808   ;;  %v553_v50 = vlaneseq  ;;  %p1407_p6 = scmp.ne.s32.totalorder %s2321_s22, 15 }
  0x6f   : > { %v337_v3 = vld [vmem:[%s2463_s21 + $0x180] sm:$0xff]  ;;  %v1747_v4 = vpack.c.bf16 %v306_v2, %v305_v1  ;;  %v338_v5 = vld [vmem:[%s2463_s21 + $0x188] sm:$0xff]  ;;  %v308_v14 = vld [vmem:[%s2463_s21 + $0x98] sm:$0xff]  ;;  %v551_v49 = vunpack.c.l.s4 %v2267_v48  ;;  %vm2269_vm0 = vmmov (!%p1407_p6), 0   ;;  %vm1302_vm1 = vcmask (!%p1407_p6), 74752  }
  0x70   : > { %v289_v6 = vld [vmem:[%s2463_s21] sm:$0xff]  ;;  %v290_v7 = vld [vmem:[%s2463_s21 + $0x8] sm:$0xff]  ;;  %v1779_v8 = vpack.c.bf16 %v338_v5, %v337_v3  ;;  %v339_v15 = vld [vmem:[%s2463_s21 + $0x190] sm:$0xff]  ;;  %v1751_v17 = vpack.c.bf16 %v308_v14, %v307_v12  ;;  %v554_v1 = vshrl.u32 %v553_v50, 7 }
  0x71   : > { %v1749_v9 = vpack.c.bf16 %v290_v7, %v289_v6  ;;  %v321_v10 = vld [vmem:[%s2463_s21 + $0x100] sm:$0xff]  ;;  %v322_v11 = vld [vmem:[%s2463_s21 + $0x108] sm:$0xff]  ;;  %1748 = vmatprep.subr.bf16.mxu0 %v1747_v4  ;;  %v340_v16 = vld [vmem:[%s2463_s21 + $0x198] sm:$0xff]  ;;  %v552_v0 = vunpack.c.0.s8 %v551_v49 }
  0x72   : > { %v1781_v13 = vpack.c.bf16 %v322_v11, %v321_v10  ;;  %1780 = vmatprep.subr.bf16.mxu1 %v1779_v8  ;;  %v1783_v18 = vpack.c.bf16 %v340_v16, %v339_v15  ;;  %v291_v19 = vld [vmem:[%s2463_s21 + $0x10] sm:$0xff]  ;;  %v292_v20 = vld [vmem:[%s2463_s21 + $0x18] sm:$0xff]  ;;  %v309_v24 = vld [vmem:[%s2463_s21 + $0xa0] sm:$0xff] }
  0x73   : > { %1750 = vmatpush3.bf16.msra.mxu0 %v1749_v9  ;;  %v323_v21 = vld [vmem:[%s2463_s21 + $0x110] sm:$0xff]  ;;  %v1753_v22 = vpack.c.bf16 %v292_v20, %v291_v19  ;;  %v324_v23 = vld [vmem:[%s2463_s21 + $0x118] sm:$0xff]  ;;  %v310_v25 = vld [vmem:[%s2463_s21 + $0xa8] sm:$0xff]  ;;  %v2531_v14 = vsub.s32 %v552_v0, %v554_v1 }
  0x74   : > { %1782 = vmatpush3.bf16.msra.mxu1 %v1781_v13  ;;  %1752 = vmatprep.subr.bf16.mxu0 %v1751_v17  ;;  %v1785_v26 = vpack.c.bf16 %v324_v23, %v323_v21  ;;  %v1755_v27 = vpack.c.bf16 %v310_v25, %v309_v24  ;;  %v341_v28 = vld [vmem:[%s2463_s21 + $0x1a0] sm:$0xff]  ;;  %v342_v29 = vld [vmem:[%s2463_s21 + $0x1a8] sm:$0xff]  ;;  %v311_v36 = vld [vmem:[%s2463_s21 + $0xb0] sm:$0xff] }
  0x75   : > { %1784 = vmatprep.subr.bf16.mxu1 %v1783_v18  ;;  %v293_v30 = vld [vmem:[%s2463_s21 + $0x20] sm:$0xff]  ;;  %v1787_v31 = vpack.c.bf16 %v342_v29, %v341_v28  ;;  %v294_v32 = vld [vmem:[%s2463_s21 + $0x28] sm:$0xff]  ;;  %v312_v37 = vld [vmem:[%s2463_s21 + $0xb8] sm:$0xff] }
  0x76   : > { %v325_v33 = vld [vmem:[%s2463_s21 + $0x120] sm:$0xff]  ;;  %v326_v34 = vld [vmem:[%s2463_s21 + $0x128] sm:$0xff]  ;;  %v1757_v35 = vpack.c.bf16 %v294_v32, %v293_v30  ;;  %v343_v38 = vld [vmem:[%s2463_s21 + $0x1b0] sm:$0xff]  ;;  %v1759_v40 = vpack.c.bf16 %v312_v37, %v311_v36 }
  0x77   : > { %1754 = vmatpush3.bf16.msra.mxu0 %v1753_v22  ;;  %v1789_v39 = vpack.c.bf16 %v326_v34, %v325_v33  ;;  %v344_v41 = vld [vmem:[%s2463_s21 + $0x1b8] sm:$0xff]  ;;  %v295_v42 = vld [vmem:[%s2463_s21 + $0x30] sm:$0xff]  ;;  %v313_v47 = vld [vmem:[%s2463_s21 + $0xc0] sm:$0xff] }
  0x78   : > { %1786 = vmatpush3.bf16.msra.mxu1 %v1785_v26  ;;  %1756 = vmatprep.subr.bf16.mxu0 %v1755_v27  ;;  %v296_v43 = vld [vmem:[%s2463_s21 + $0x38] sm:$0xff]  ;;  %v1791_v44 = vpack.c.bf16 %v344_v41, %v343_v38  ;;  %v327_v45 = vld [vmem:[%s2463_s21 + $0x130] sm:$0xff]  ;;  %v314_v51 = vld [vmem:[%s2463_s21 + $0xc8] sm:$0xff] }
  0x79   : > { %1788 = vmatprep.subr.bf16.mxu1 %v1787_v31  ;;  %v328_v46 = vld [vmem:[%s2463_s21 + $0x138] sm:$0xff]  ;;  %v345_v52 = vld [vmem:[%s2463_s21 + $0x1c0] sm:$0xff]  ;;  %v346_v53 = vld [vmem:[%s2463_s21 + $0x1c8] sm:$0xff]  ;;  %v1761_v54 = vpack.c.bf16 %v296_v43, %v295_v42  ;;  %v1763_v56 = vpack.c.bf16 %v314_v51, %v313_v47 }
  0x7a   : > { %v1793_v55 = vpack.c.bf16 %v328_v46, %v327_v45  ;;  %v297_v57 = vld [vmem:[%s2463_s21 + $0x40] sm:$0xff]  ;;  %v298_v58 = vld [vmem:[%s2463_s21 + $0x48] sm:$0xff]  ;;  %v1795_v60 = vpack.c.bf16 %v346_v53, %v345_v52  ;;  %v315_v62 = vld [vmem:[%s2463_s21 + $0xd0] sm:$0xff] }
  0x7b   : > { %1758 = vmatpush3.bf16.msra.mxu0 %v1757_v35  ;;  %v329_v59 = vld [vmem:[%s2463_s21 + $0x140] sm:$0xff]  ;;  %v330_v61 = vld [vmem:[%s2463_s21 + $0x148] sm:$0xff]  ;;  %v316_v63 = vld [vmem:[%s2463_s21 + $0xd8] sm:$0xff]  ;;  %v1765_v4 = vpack.c.bf16 %v298_v58, %v297_v57 }
  0x7c   : > { %1790 = vmatpush3.bf16.msra.mxu1 %v1789_v39  ;;  %1760 = vmatprep.subr.bf16.mxu0 %v1759_v40  ;;  %v347_v2 = vld [vmem:[%s2463_s21 + $0x1d0] sm:$0xff]  ;;  %v348_v3 = vld [vmem:[%s2463_s21 + $0x1d8] sm:$0xff]  ;;  %v1797_v5 = vpack.c.bf16 %v330_v61, %v329_v59  ;;  %v1767_v6 = vpack.c.bf16 %v316_v63, %v315_v62  ;;  %v317_v12 = vld [vmem:[%s2463_s21 + $0xe0] sm:$0xff] }
  0x7d   : > { %1792 = vmatprep.subr.bf16.mxu1 %v1791_v44  ;;  %v299_v7 = vld [vmem:[%s2463_s21 + $0x50] sm:$0xff]  ;;  %v300_v8 = vld [vmem:[%s2463_s21 + $0x58] sm:$0xff]  ;;  %v1799_v10 = vpack.c.bf16 %v348_v3, %v347_v2  ;;  %v318_v13 = vld [vmem:[%s2463_s21 + $0xe8] sm:$0xff] }
  0x7e   : > { %v331_v9 = vld [vmem:[%s2463_s21 + $0x150] sm:$0xff]  ;;  %v332_v11 = vld [vmem:[%s2463_s21 + $0x158] sm:$0xff]  ;;  %v349_v15 = vld [vmem:[%s2463_s21 + $0x1e0] sm:$0xff]  ;;  %v1769_v17 = vpack.c.bf16 %v300_v8, %v299_v7  ;;  %v1771_v20 = vpack.c.bf16 %v318_v13, %v317_v12 }
  0x7f   : > { %1762 = vmatpush3.bf16.msra.mxu0 %v1761_v54  ;;  %v350_v16 = vld [vmem:[%s2463_s21 + $0x1e8] sm:$0xff]  ;;  %v301_v18 = vld [vmem:[%s2463_s21 + $0x60] sm:$0xff]  ;;  %v1801_v19 = vpack.c.bf16 %v332_v11, %v331_v9  ;;  %v319_v26 = vld [vmem:[%s2463_s21 + $0xf0] sm:$0xff] }
  0x80   : > { %1794 = vmatpush3.bf16.msra.mxu1 %v1793_v55  ;;  %1764 = vmatprep.subr.bf16.mxu0 %v1763_v56  ;;  %v302_v21 = vld [vmem:[%s2463_s21 + $0x68] sm:$0xff]  ;;  %v333_v22 = vld [vmem:[%s2463_s21 + $0x160] sm:$0xff]  ;;  %v1803_v24 = vpack.c.bf16 %v350_v16, %v349_v15  ;;  %v320_v27 = vld [vmem:[%s2463_s21 + $0xf8] sm:$0xff] }
  0x81   : > { %1796 = vmatprep.subr.bf16.mxu1 %v1795_v60  ;;  %v285_v23 = vld [vmem:[%s2477_s15] sm:$0xff]  ;;  %v334_v25 = vld [vmem:[%s2463_s21 + $0x168] sm:$0xff]  ;;  %v351_v30 = vld [vmem:[%s2463_s21 + $0x1f0] sm:$0xff]  ;;  %v1773_v32 = vpack.c.bf16 %v302_v21, %v301_v18  ;;  %v1775_v36 = vpack.c.bf16 %v320_v27, %v319_v26 }
  0x82   : > { %v556_v28 = vrot.slane %v285_v23, %v2531_v14  ;;  %v549_v29 = vcombine.high %v285_v23, %v285_v23  ;;  %v352_v31 = vld [vmem:[%s2463_s21 + $0x1f8] sm:$0xff]  ;;  %v1805_v35 = vpack.c.bf16 %v334_v25, %v333_v22  ;;  %v303_v37 = vld [vmem:[%s2463_s21 + $0x70] sm:$0xff]  ;;  %v369_v43 = vld [vmem:[%s2463_s21 + $0x280] sm:$0xff] }
  0x83   : > { %1766 = vmatpush3.bf16.msra.mxu0 %v1765_v4  ;;  %v304_v38 = vld [vmem:[%s2463_s21 + $0x78] sm:$0xff]  ;;  %v335_v39 = vld [vmem:[%s2463_s21 + $0x170] sm:$0xff]  ;;  %v1807_v40 = vpack.c.bf16 %v352_v31, %v351_v30  ;;  %v370_v44 = vld [vmem:[%s2463_s21 + $0x288] sm:$0xff] }
  0x84   : > { %1798 = vmatpush3.bf16.msra.mxu1 %v1797_v5  ;;  %1768 = vmatprep.subr.bf16.mxu0 %v1767_v6  ;;  %v564_v33 = vcombine.high %v556_v28, %v556_v28  ;;  %v563_v34 = vrot.slane %v549_v29, %v2531_v14  ;;  %v336_v41 = vld [vmem:[%s2463_s21 + $0x178] sm:$0xff]  ;;  %v401_v45 = vld [vmem:[%s2463_s21 + $0x380] sm:$0xff]  ;;  %v402_v46 = vld [vmem:[%s2463_s21 + $0x388] sm:$0xff]  ;;  %v1777_v47 = vpack.c.bf16 %v304_v38, %v303_v37 }
  0x85   : > { %1800 = vmatprep.subr.bf16.mxu1 %v1799_v10  ;;  %v1809_v48 = vpack.c.bf16 %v336_v41, %v335_v39  ;;  %v1811_v49 = vpack.c.bf16 %v370_v44, %v369_v43  ;;  %v353_v50 = vld [vmem:[%s2463_s21 + $0x200] sm:$0xff]  ;;  %v354_v51 = vld [vmem:[%s2463_s21 + $0x208] sm:$0xff]  ;;  %v1843_v53 = vpack.c.bf16 %v402_v46, %v401_v45  ;;  %v371_v55 = vld [vmem:[%s2463_s21 + $0x290] sm:$0xff] }
  0x86   : > { %697 = vmatprep.mubr.f32.mxu0 %v564_v33  ;;  %v565_v42 = vcombine.high %v563_v34, %v563_v34  ;;  %v385_v52 = vld [vmem:[%s2463_s21 + $0x300] sm:$0xff]  ;;  %v386_v54 = vld [vmem:[%s2463_s21 + $0x308] sm:$0xff]  ;;  %v372_v56 = vld [vmem:[%s2463_s21 + $0x298] sm:$0xff]  ;;  %v1813_v59 = vpack.c.bf16 %v354_v51, %v353_v50 }
  0x87   : > { %1770 = vmatpush3.bf16.msra.mxu0 %v1769_v17  ;;  %v403_v57 = vld [vmem:[%s2463_s21 + $0x390] sm:$0xff]  ;;  %v404_v58 = vld [vmem:[%s2463_s21 + $0x398] sm:$0xff]  ;;  %v1845_v60 = vpack.c.bf16 %v386_v54, %v385_v52  ;;  %v1815_v61 = vpack.c.bf16 %v372_v56, %v371_v55  ;;  %v373_v3 = vld [vmem:[%s2463_s21 + $0x2a0] sm:$0xff] }
  0x88   : > { %1802 = vmatpush3.bf16.msra.mxu1 %v1801_v19  ;;  %1772 = vmatprep.subr.bf16.mxu0 %v1771_v20  ;;  %v355_v62 = vld [vmem:[%s2463_s21 + $0x210] sm:$0xff]  ;;  %v356_v63 = vld [vmem:[%s2463_s21 + $0x218] sm:$0xff]  ;;  %v1847_v1 = vpack.c.bf16 %v404_v58, %v403_v57  ;;  %v374_v4 = vld [vmem:[%s2463_s21 + $0x2a8] sm:$0xff] }
  0x89   : > { %1804 = vmatprep.subr.bf16.mxu1 %v1803_v24  ;;  %767 = vmatprep.mubr.f32.mxu1 %v565_v42  ;;  %v387_v0 = vld [vmem:[%s2463_s21 + $0x310] sm:$0xff]  ;;  %v388_v2 = vld [vmem:[%s2463_s21 + $0x318] sm:$0xff]  ;;  %v405_v5 = vld [vmem:[%s2463_s21 + $0x3a0] sm:$0xff]  ;;  %v1817_v7 = vpack.c.bf16 %v356_v63, %v355_v62  ;;  %v1819_v9 = vpack.c.bf16 %v374_v4, %v373_v3 }
  0x8a   : > { %v406_v6 = vld [vmem:[%s2463_s21 + $0x3a8] sm:$0xff]  ;;  %v1849_v8 = vpack.c.bf16 %v388_v2, %v387_v0  ;;  %v357_v10 = vld [vmem:[%s2463_s21 + $0x220] sm:$0xff]  ;;  %v375_v16 = vld [vmem:[%s2463_s21 + $0x2b0] sm:$0xff] }
  0x8b   : > { %1774 = vmatpush3.bf16.msra.mxu0 %v1773_v32  ;;  %v358_v11 = vld [vmem:[%s2463_s21 + $0x228] sm:$0xff]  ;;  %v389_v12 = vld [vmem:[%s2463_s21 + $0x320] sm:$0xff]  ;;  %v1851_v13 = vpack.c.bf16 %v406_v6, %v405_v5  ;;  %v376_v17 = vld [vmem:[%s2463_s21 + $0x2b8] sm:$0xff] }
  0x8c   : > { %1806 = vmatpush3.bf16.msra.mxu1 %v1805_v35  ;;  %1776 = vmatprep.subr.bf16.mxu0 %v1775_v36  ;;  %v390_v15 = vld [vmem:[%s2463_s21 + $0x328] sm:$0xff]  ;;  %v407_v18 = vld [vmem:[%s2463_s21 + $0x3b0] sm:$0xff]  ;;  %v408_v19 = vld [vmem:[%s2463_s21 + $0x3b8] sm:$0xff]  ;;  %v1821_v20 = vpack.c.bf16 %v358_v11, %v357_v10  ;;  %v1823_v22 = vpack.c.bf16 %v376_v17, %v375_v16 }
  0x8d   : > { %1808 = vmatprep.subr.bf16.mxu1 %v1807_v40  ;;  %v1853_v21 = vpack.c.bf16 %v390_v15, %v389_v12  ;;  %v359_v23 = vld [vmem:[%s2463_s21 + $0x230] sm:$0xff]  ;;  %v360_v24 = vld [vmem:[%s2463_s21 + $0x238] sm:$0xff]  ;;  %v1855_v26 = vpack.c.bf16 %v408_v19, %v407_v18  ;;  %v378_v29 = vld [vmem:[%s2463_s21 + $0x2c8] sm:$0xff] }
  0x8e   : > { %v391_v25 = vld [vmem:[%s2463_s21 + $0x330] sm:$0xff]  ;;  %v392_v27 = vld [vmem:[%s2463_s21 + $0x338] sm:$0xff]  ;;  %v409_v30 = vld [vmem:[%s2463_s21 + $0x3c0] sm:$0xff]  ;;  %v1825_v33 = vpack.c.bf16 %v360_v24, %v359_v23 }
  0x8f   : > { %1778 = vmatpush3.bf16.msra.mxu0 %v1777_v47  ;;  %v410_v31 = vld [vmem:[%s2463_s21 + $0x3c8] sm:$0xff]  ;;  %v1857_v36 = vpack.c.bf16 %v392_v27, %v391_v25  ;;  %v361_v38 = vld [vmem:[%s2463_s21 + $0x240] sm:$0xff]  ;;  %v379_v43 = vld [vmem:[%s2463_s21 + $0x2d0] sm:$0xff] }
  0x90   : > { %1810 = vmatpush3.bf16.msra.mxu1 %v1809_v48  ;;  %1812 = vmatprep.subr.bf16.mxu0 %v1811_v49  ;;  %v286_v32 = vld [vmem:[%s2477_s15 + $0x8] sm:$0xff]  ;;  %v1859_v41 = vpack.c.bf16 %v410_v31, %v409_v30  ;;  %v380_v44 = vld [vmem:[%s2463_s21 + $0x2d8] sm:$0xff]  ;;  %v411_v47 = vld [vmem:[%s2463_s21 + $0x3d0] sm:$0xff] }
  0x91   : > { %1844 = vmatprep.subr.bf16.mxu1 %v1843_v53  ;;  %v566_v35 = vcombine.high %v286_v32, %v286_v32  ;;  %v362_v39 = vld [vmem:[%s2463_s21 + $0x248] sm:$0xff]  ;;  %v393_v40 = vld [vmem:[%s2463_s21 + $0x340] sm:$0xff]  ;;  %v412_v48 = vld [vmem:[%s2463_s21 + $0x3d8] sm:$0xff]  ;;  %v1831_v52 = vpack.c.bf16 %v380_v44, %v379_v43 }
  0x92   : > { %698 = vmatmul.mubr.f32.vlgmr.msra.gmra.mrb[0].mxu0 %v556_v28  ;;  %v377_v28 = vld [vmem:[%s2463_s21 + $0x2c0] sm:$0xff]  ;;  %v394_v42 = vld [vmem:[%s2463_s21 + $0x348] sm:$0xff]  ;;  %v1829_v49 = vpack.c.bf16 %v362_v39, %v361_v38  ;;  %v363_v53 = vld [vmem:[%s2463_s21 + $0x250] sm:$0xff]  ;;  %v1863_v56 = vpack.c.bf16 %v412_v48, %v411_v47 }
  0x93   : > { %768 = vmatmul.mubr.f32.vlgmr.msra.gmra.mrb[0].mxu1 %v563_v34  ;;  %1814 = vmatpush3.bf16.msra.mxu0 %v1813_v59  ;;  %v2588_v34 = vrot.slane %v286_v32, %v2531_v14  ;;  %v1827_v37 = vpack.c.bf16 %v378_v29, %v377_v28  ;;  %v2599_v46 = vrot.slane %v566_v35, %v2531_v14  ;;  %v364_v54 = vld [vmem:[%s2463_s21 + $0x258] sm:$0xff]  ;;  %v395_v55 = vld [vmem:[%s2463_s21 + $0x350] sm:$0xff]  ;;  %v381_v58 = vld [vmem:[%s2463_s21 + $0x2e0] sm:$0xff] }
  0x94   : > { %1846 = vmatpush3.bf16.msra.mxu1 %v1845_v60  ;;  %1816 = vmatprep.subr.bf16.mxu0 %v1815_v61  ;;  %v1861_v51 = vpack.c.bf16 %v394_v42, %v393_v40  ;;  %v396_v57 = vld [vmem:[%s2463_s21 + $0x358] sm:$0xff]  ;;  %v382_v59 = vld [vmem:[%s2463_s21 + $0x2e8] sm:$0xff]  ;;  %v413_v60 = vld [vmem:[%s2463_s21 + $0x3e0] sm:$0xff]  ;;  %v1833_v62 = vpack.c.bf16 %v364_v54, %v363_v53 }
  0x95   : > { %1848 = vmatprep.subr.bf16.mxu1 %v1847_v1  ;;  %v581_v45 = vcombine.high %v2588_v34, %v2588_v34  ;;  %v582_v50 = vcombine.high %v2599_v46, %v2599_v46  ;;  %v414_v61 = vld [vmem:[%s2463_s21 + $0x3e8] sm:$0xff]  ;;  %v1865_v63 = vpack.c.bf16 %v396_v57, %v395_v55  ;;  %v1835_v0 = vpack.c.bf16 %v382_v59, %v381_v58  ;;  %v365_v1 = vld [vmem:[%s2463_s21 + $0x260] sm:$0xff]  ;;  %v383_v6 = vld [vmem:[%s2463_s21 + $0x2f0] sm:$0xff] }
  0x96   : > { %v366_v2 = vld [vmem:[%s2463_s21 + $0x268] sm:$0xff]  ;;  %v397_v3 = vld [vmem:[%s2463_s21 + $0x360] sm:$0xff]  ;;  %v1867_v4 = vpack.c.bf16 %v414_v61, %v413_v60  ;;  %v368_v15 = vld [vmem:[%s2463_s21 + $0x278] sm:$0xff] }
  0x97   : > { %1818 = vmatpush3.bf16.msra.mxu0 %v1817_v7  ;;  %837 = vmatprep.mubr.f32.mxu0 %v581_v45  ;;  %v398_v5 = vld [vmem:[%s2463_s21 + $0x368] sm:$0xff]  ;;  %v384_v7 = vld [vmem:[%s2463_s21 + $0x2f8] sm:$0xff]  ;;  %v1837_v10 = vpack.c.bf16 %v366_v2, %v365_v1  ;;  %v399_v16 = vld [vmem:[%s2463_s21 + $0x370] sm:$0xff] }
  0x98   : > { %1850 = vmatpush3.bf16.msra.mxu1 %v1849_v8  ;;  %1820 = vmatprep.subr.bf16.mxu0 %v1819_v9  ;;  %v415_v8 = vld [vmem:[%s2463_s21 + $0x3f0] sm:$0xff]  ;;  %v416_v9 = vld [vmem:[%s2463_s21 + $0x3f8] sm:$0xff]  ;;  %v1869_v11 = vpack.c.bf16 %v398_v5, %v397_v3  ;;  %v1839_v12 = vpack.c.bf16 %v384_v7, %v383_v6  ;;  %v433_v19 = vld [vmem:[%s2463_s21 + $0x480] sm:$0xff] }
  0x99   : > { %1852 = vmatprep.subr.bf16.mxu1 %v1851_v13  ;;  %907 = vmatprep.mubr.f32.mxu1 %v582_v50  ;;  %v367_v13 = vld [vmem:[%s2463_s21 + $0x270] sm:$0xff]  ;;  %v1871_v17 = vpack.c.bf16 %v416_v9, %v415_v8  ;;  %v400_v18 = vld [vmem:[%s2463_s21 + $0x378] sm:$0xff]  ;;  %v417_v24 = vld [vmem:[%s2463_s21 + $0x400] sm:$0xff] }
  0x9a   : > { %v1841_v23 = vpack.c.bf16 %v368_v15, %v367_v13  ;;  %v1873_v25 = vpack.c.bf16 %v400_v18, %v399_v16  ;;  %v418_v27 = vld [vmem:[%s2463_s21 + $0x408] sm:$0xff]  ;;  %v449_v28 = vld [vmem:[%s2463_s21 + $0x500] sm:$0xff]  ;;  %v435_v31 = vld [vmem:[%s2463_s21 + $0x490] sm:$0xff] }
  0x9b   : > { %1822 = vmatpush3.bf16.msra.mxu0 %v1821_v20  ;;  %v434_v20 = vld [vmem:[%s2463_s21 + $0x488] sm:$0xff]  ;;  %v436_v32 = vld [vmem:[%s2463_s21 + $0x498] sm:$0xff]  ;;  %v419_v40 = vld [vmem:[%s2463_s21 + $0x410] sm:$0xff] }
  0x9c   : > { %1854 = vmatpush3.bf16.msra.mxu1 %v1853_v21  ;;  %1824 = vmatprep.subr.bf16.mxu0 %v1823_v22  ;;  %v465_v21 = vld [vmem:[%s2463_s21 + $0x580] sm:$0xff]  ;;  %v466_v22 = vld [vmem:[%s2463_s21 + $0x588] sm:$0xff]  ;;  %v468_v35 = vld [vmem:[%s2463_s21 + $0x598] sm:$0xff]  ;;  %v1879_v39 = vpack.c.bf16 %v436_v32, %v435_v31 }
  0x9d   : > { %1856 = vmatprep.subr.bf16.mxu1 %v1855_v26  ;;  %v1875_v26 = vpack.c.bf16 %v434_v20, %v433_v19  ;;  %v450_v29 = vld [vmem:[%s2463_s21 + $0x508] sm:$0xff]  ;;  %v1907_v30 = vpack.c.bf16 %v466_v22, %v465_v21  ;;  %v451_v42 = vld [vmem:[%s2463_s21 + $0x510] sm:$0xff]  ;;  %v452_v47 = vld [vmem:[%s2463_s21 + $0x518] sm:$0xff] }
  0x9e   : > { %v287_v38 = vld [vmem:[%s2477_s15 + $0x10] sm:$0xff]  ;;  %v437_v48 = vld [vmem:[%s2463_s21 + $0x4a0] sm:$0xff]  ;;  %v424_v5 = vld [vmem:[%s2463_s21 + $0x438] sm:$0xff] }
  0x9f   : > { %1826 = vmatpush3.bf16.msra.mxu0 %v1825_v33  ;;  %v467_v33 = vld [vmem:[%s2463_s21 + $0x590] sm:$0xff]  ;;  %v2642_v43 = vrot.slane %v287_v38, %v2531_v14  ;;  %v583_v44 = vcombine.high %v287_v38, %v287_v38  ;;  %v469_v50 = vld [vmem:[%s2463_s21 + $0x5a0] sm:$0xff]  ;;  %v422_v57 = vld [vmem:[%s2463_s21 + $0x428] sm:$0xff] }
  0xa0   : > { %1858 = vmatpush3.bf16.msra.mxu1 %v1857_v36  ;;  %1828 = vmatprep.subr.bf16.mxu0 %v1827_v37  ;;  %v1877_v36 = vpack.c.bf16 %v418_v27, %v417_v24  ;;  %v1909_v37 = vpack.c.bf16 %v450_v29, %v449_v28  ;;  %v1911_v45 = vpack.c.bf16 %v468_v35, %v467_v33  ;;  %v453_v58 = vld [vmem:[%s2463_s21 + $0x520] sm:$0xff]  ;;  %v454_v61 = vld [vmem:[%s2463_s21 + $0x528] sm:$0xff]  ;;  %v455_v6 = vld [vmem:[%s2463_s21 + $0x530] sm:$0xff] }
  0xa1   : > { %1860 = vmatprep.subr.bf16.mxu1 %v1859_v41  ;;  %v420_v41 = vld [vmem:[%s2463_s21 + $0x418] sm:$0xff]  ;;  %v2653_v53 = vrot.slane %v583_v44, %v2531_v14  ;;  %v1917_v2 = vpack.c.bf16 %v454_v61, %v453_v58  ;;  %v441_v9 = vld [vmem:[%s2463_s21 + $0x4c0] sm:$0xff]  ;;  %v426_v18 = vld [vmem:[%s2463_s21 + $0x448] sm:$0xff] }
  0xa2   : > { %v1881_v54 = vpack.c.bf16 %v420_v41, %v419_v40  ;;  %v456_v8 = vld [vmem:[%s2463_s21 + $0x538] sm:$0xff]  ;;  %v457_v19 = vld [vmem:[%s2463_s21 + $0x540] sm:$0xff]  ;;  %v458_v21 = vld [vmem:[%s2463_s21 + $0x548] sm:$0xff] }
  0xa3   : > { %1830 = vmatpush3.bf16.msra.mxu0 %v1829_v49  ;;  %v438_v49 = vld [vmem:[%s2463_s21 + $0x4a8] sm:$0xff]  ;;  %v599_v59 = vcombine.high %v2653_v53, %v2653_v53  ;;  %v1921_v15 = vpack.c.bf16 %v456_v8, %v455_v6  ;;  %v443_v22 = vld [vmem:[%s2463_s21 + $0x4d0] sm:$0xff]  ;;  %v1925_v27 = vpack.c.bf16 %v458_v21, %v457_v19  ;;  %v460_v33 = vld [vmem:[%s2463_s21 + $0x558] sm:$0xff] }
  0xa4   : > { %1862 = vmatpush3.bf16.msra.mxu1 %v1861_v51  ;;  %1832 = vmatprep.subr.bf16.mxu0 %v1831_v52  ;;  %v470_v51 = vld [vmem:[%s2463_s21 + $0x5a8] sm:$0xff]  ;;  %v598_v52 = vcombine.high %v2642_v43, %v2642_v43  ;;  %v1883_v55 = vpack.c.bf16 %v438_v49, %v437_v48  ;;  %v475_v24 = vld [vmem:[%s2463_s21 + $0x5d0] sm:$0xff]  ;;  %v445_v35 = vld [vmem:[%s2463_s21 + $0x4e0] sm:$0xff] }
  0xa5   : > { %1864 = vmatprep.subr.bf16.mxu1 %v1863_v56  ;;  %v421_v56 = vld [vmem:[%s2463_s21 + $0x420] sm:$0xff]  ;;  %v1915_v60 = vpack.c.bf16 %v470_v51, %v469_v50  ;;  %v427_v29 = vld [vmem:[%s2463_s21 + $0x450] sm:$0xff]  ;;  %v478_v38 = vld [vmem:[%s2463_s21 + $0x5e8] sm:$0xff] }
  0xa6   : > { %v1885_v1 = vpack.c.bf16 %v422_v57, %v421_v56  ;;  %v459_v31 = vld [vmem:[%s2463_s21 + $0x550] sm:$0xff]  ;;  %v430_v44 = vld [vmem:[%s2463_s21 + $0x468] sm:$0xff]  ;;  %v448_v50 = vld [vmem:[%s2463_s21 + $0x4f8] sm:$0xff] }
  0xa7   : > { %1834 = vmatpush3.bf16.msra.mxu0 %v1833_v62  ;;  %v440_v62 = vld [vmem:[%s2463_s21 + $0x4b8] sm:$0xff]  ;;  %v1929_v40 = vpack.c.bf16 %v460_v33, %v459_v31  ;;  %v462_v48 = vld [vmem:[%s2463_s21 + $0x568] sm:$0xff]  ;;  %v447_v49 = vld [vmem:[%s2463_s21 + $0x4f0] sm:$0xff] }
  0xa8   : > { %1866 = vmatpush3.bf16.msra.mxu1 %v1865_v63  ;;  %1836 = vmatprep.subr.bf16.mxu0 %v1835_v0  ;;  %v471_v63 = vld [vmem:[%s2463_s21 + $0x5b0] sm:$0xff]  ;;  %v472_v0 = vld [vmem:[%s2463_s21 + $0x5b8] sm:$0xff]  ;;  %v1903_v56 = vpack.c.bf16 %v448_v50, %v447_v49  ;;  %v482_v6 = vld [vmem:[%s2463_s21 + $0x608] sm:$0xff] }
  0xa9   : > { %1868 = vmatprep.subr.bf16.mxu1 %v1867_v4  ;;  %v423_v4 = vld [vmem:[%s2463_s21 + $0x430] sm:$0xff]  ;;  %v1919_v7 = vpack.c.bf16 %v472_v0, %v471_v63  ;;  %v432_v58 = vld [vmem:[%s2463_s21 + $0x478] sm:$0xff]  ;;  %v529_v63 = vld [vmem:[%s2463_s21 + $0x780] sm:$0xff] }
  0xaa   : > { %v1889_v13 = vpack.c.bf16 %v424_v5, %v423_v4  ;;  %v479_v51 = vld [vmem:[%s2463_s21 + $0x5f0] sm:$0xff]  ;;  %v464_v61 = vld [vmem:[%s2463_s21 + $0x578] sm:$0xff]  ;;  %v530_v0 = vld [vmem:[%s2463_s21 + $0x788] sm:$0xff] }
  0xab   : > { %1838 = vmatpush3.bf16.msra.mxu0 %v1837_v10  ;;  %v442_v10 = vld [vmem:[%s2463_s21 + $0x4c8] sm:$0xff]  ;;  %v431_v57 = vld [vmem:[%s2463_s21 + $0x470] sm:$0xff]  ;;  %v481_v5 = vld [vmem:[%s2463_s21 + $0x600] sm:$0xff]  ;;  %v1971_v8 = vpack.c.bf16 %v530_v0, %v529_v63 }
  0xac   : > { %1870 = vmatpush3.bf16.msra.mxu1 %v1869_v11  ;;  %1840 = vmatprep.subr.bf16.mxu0 %v1839_v12  ;;  %v473_v11 = vld [vmem:[%s2463_s21 + $0x5c0] sm:$0xff]  ;;  %v474_v12 = vld [vmem:[%s2463_s21 + $0x5c8] sm:$0xff]  ;;  %v1891_v16 = vpack.c.bf16 %v442_v10, %v441_v9  ;;  %v499_v10 = vld [vmem:[%s2463_s21 + $0x690] sm:$0xff] }
  0xad   : > { %1872 = vmatprep.subr.bf16.mxu1 %v1871_v17  ;;  %v425_v17 = vld [vmem:[%s2463_s21 + $0x440] sm:$0xff]  ;;  %v1923_v20 = vpack.c.bf16 %v474_v12, %v473_v11  ;;  %v514_v9 = vld [vmem:[%s2463_s21 + $0x708] sm:$0xff]  ;;  %v500_v11 = vld [vmem:[%s2463_s21 + $0x698] sm:$0xff] }
  0xae   : > { %v1943_v19 = vpack.c.bf16 %v500_v11, %v499_v10  ;;  %v484_v21 = vld [vmem:[%s2463_s21 + $0x618] sm:$0xff]  ;;  %v485_v33 = vld [vmem:[%s2463_s21 + $0x620] sm:$0xff]  ;;  %v539_v0 = vld [vmem:[%s2463_s21 + $0x7d0] sm:$0xff] }
  0xaf   : > { %1842 = vmatpush3.bf16.msra.mxu0 %v1841_v23  ;;  %v444_v23 = vld [vmem:[%s2463_s21 + $0x4d8] sm:$0xff]  ;;  %v509_v10 = vld [vmem:[%s2463_s21 + $0x6e0] sm:$0xff]  ;;  %v510_v11 = vld [vmem:[%s2463_s21 + $0x6e8] sm:$0xff] }
  0xb0   : > { %1874 = vmatpush3.bf16.msra.mxu1 %v1873_v25  ;;  %1876 = vmatprep.subr.bf16.mxu0 %v1875_v26  ;;  %v476_v25 = vld [vmem:[%s2463_s21 + $0x5d8] sm:$0xff]  ;;  %v1893_v26 = vpack.c.bf16 %v426_v18, %v425_v17  ;;  %v1895_v28 = vpack.c.bf16 %v444_v23, %v443_v22  ;;  %v1941_v17 = vpack.c.bf16 %v482_v6, %v481_v5  ;;  %v515_v22 = vld [vmem:[%s2463_s21 + $0x710] sm:$0xff] }
  0xb1   : > { %1908 = vmatprep.subr.bf16.mxu1 %v1907_v30  ;;  %v428_v30 = vld [vmem:[%s2463_s21 + $0x458] sm:$0xff]  ;;  %v1927_v32 = vpack.c.bf16 %v476_v25, %v475_v24  ;;  %v501_v25 = vld [vmem:[%s2463_s21 + $0x6a0] sm:$0xff]  ;;  %v491_v5 = vld [vmem:[%s2463_s21 + $0x650] sm:$0xff] }
  0xb2   : > { %838 = vmatmul.mubr.f32.vlgmr.msra.gmra.mrb[2].mxu0 %v2588_v34  ;;  %v1913_v34 = vpack.c.bf16 %v452_v47, %v451_v42  ;;  %v429_v42 = vld [vmem:[%s2463_s21 + $0x460] sm:$0xff]  ;;  %v516_v24 = vld [vmem:[%s2463_s21 + $0x718] sm:$0xff] }
  0xb3   : > { %1878 = vmatpush3.bf16.msra.mxu0 %v1877_v36  ;;  %908 = vmatmul.mubr.f32.vlgmr.msra.gmra.mrb[2].mxu1 %v2599_v46  ;;  %v439_v46 = vld [vmem:[%s2463_s21 + $0x4b0] sm:$0xff]  ;;  %v446_v36 = vld [vmem:[%s2463_s21 + $0x4e8] sm:$0xff]  ;;  %v1977_v31 = vpack.c.bf16 %v516_v24, %v515_v22  ;;  %v520_v50 = vld [vmem:[%s2463_s21 + $0x738] sm:$0xff] }
  0xb4   : > { %1910 = vmatpush3.bf16.msra.mxu1 %v1909_v37  ;;  %1880 = vmatprep.subr.bf16.mxu0 %v1879_v39  ;;  %v1887_v3 = vpack.c.bf16 %v440_v62, %v439_v46  ;;  %v477_v37 = vld [vmem:[%s2463_s21 + $0x5e0] sm:$0xff]  ;;  %v1897_v39 = vpack.c.bf16 %v428_v30, %v427_v29  ;;  %v1899_v41 = vpack.c.bf16 %v446_v36, %v445_v35  ;;  %v498_v62 = vld [vmem:[%s2463_s21 + $0x688] sm:$0xff]  ;;  %v508_v63 = vld [vmem:[%s2463_s21 + $0x6d8] sm:$0xff] }
  0xb5   : > { %1912 = vmatprep.subr.bf16.mxu1 %v1911_v45  ;;  %977 = vmatprep.mubr.f32.mxu0 %v598_v52  ;;  %v461_v45 = vld [vmem:[%s2463_s21 + $0x560] sm:$0xff]  ;;  %v1931_v47 = vpack.c.bf16 %v478_v38, %v477_v37  ;;  %v480_v52 = vld [vmem:[%s2463_s21 + $0x5f8] sm:$0xff]  ;;  %v518_v37 = vld [vmem:[%s2463_s21 + $0x728] sm:$0xff] }
  0xb6   : > { %1047 = vmatprep.mubr.f32.mxu1 %v599_v59  ;;  %v463_v59 = vld [vmem:[%s2463_s21 + $0x570] sm:$0xff]  ;;  %v497_v46 = vld [vmem:[%s2463_s21 + $0x680] sm:$0xff]  ;;  %v492_v6 = vld [vmem:[%s2463_s21 + $0x658] sm:$0xff] }
  0xb7   : > { %1882 = vmatpush3.bf16.msra.mxu0 %v1881_v54  ;;  %v1901_v54 = vpack.c.bf16 %v430_v44, %v429_v42  ;;  %v1939_v4 = vpack.c.bf16 %v498_v62, %v497_v46  ;;  %v517_v35 = vld [vmem:[%s2463_s21 + $0x720] sm:$0xff]  ;;  %v503_v38 = vld [vmem:[%s2463_s21 + $0x6b0] sm:$0xff]  ;;  %v522_v46 = vld [vmem:[%s2463_s21 + $0x748] sm:$0xff] }
  0xb8   : > { %1914 = vmatpush3.bf16.msra.mxu1 %v1913_v34  ;;  %1884 = vmatprep.subr.bf16.mxu0 %v1883_v55  ;;  %v288_v34 = vld [vmem:[%s2477_s15 + $0x18] sm:$0xff]  ;;  %v1933_v55 = vpack.c.bf16 %v462_v48, %v461_v45  ;;  %v1981_v42 = vpack.c.bf16 %v518_v37, %v517_v35  ;;  %v525_v22 = vld [vmem:[%s2463_s21 + $0x760] sm:$0xff]  ;;  %v526_v24 = vld [vmem:[%s2463_s21 + $0x768] sm:$0xff] }
  0xb9   : > { %1916 = vmatprep.subr.bf16.mxu1 %v1915_v60  ;;  %v1935_v60 = vpack.c.bf16 %v480_v52, %v479_v51  ;;  %v2714_v12 = vrot.slane %v288_v34, %v2531_v14  ;;  %v487_v45 = vld [vmem:[%s2463_s21 + $0x630] sm:$0xff]  ;;  %v505_v51 = vld [vmem:[%s2463_s21 + $0x6c0] sm:$0xff]  ;;  %v506_v52 = vld [vmem:[%s2463_s21 + $0x6c8] sm:$0xff] }
  0xba   : > { %v519_v48 = vld [vmem:[%s2463_s21 + $0x730] sm:$0xff]  ;;  %v528_v35 = vld [vmem:[%s2463_s21 + $0x778] sm:$0xff] }
  0xbb   : > { %1886 = vmatpush3.bf16.msra.mxu0 %v1885_v1  ;;  %v600_v1 = vcombine.high %v288_v34, %v288_v34  ;;  %v538_v34 = vld [vmem:[%s2463_s21 + $0x7c8] sm:$0xff]  ;;  %v507_v62 = vld [vmem:[%s2463_s21 + $0x6d0] sm:$0xff] }
  0xbc   : > { %1918 = vmatpush3.bf16.msra.mxu1 %v1917_v2  ;;  %1888 = vmatprep.subr.bf16.mxu0 %v1887_v3  ;;  %v1905_v2 = vpack.c.bf16 %v432_v58, %v431_v57  ;;  %v1937_v3 = vpack.c.bf16 %v464_v61, %v463_v59  ;;  %v1955_v57 = vpack.c.bf16 %v506_v52, %v505_v51  ;;  %v489_v58 = vld [vmem:[%s2463_s21 + $0x640] sm:$0xff]  ;;  %v490_v59 = vld [vmem:[%s2463_s21 + $0x648] sm:$0xff] }
  0xbd   : > { %1920 = vmatprep.subr.bf16.mxu1 %v1919_v7  ;;  %v513_v7 = vld [vmem:[%s2463_s21 + $0x700] sm:$0xff] }
  0xbe   : > { %v1973_v18 = vpack.c.bf16 %v514_v9, %v513_v7  ;;  %v523_v7 = vld [vmem:[%s2463_s21 + $0x750] sm:$0xff]  ;;  %v524_v9 = vld [vmem:[%s2463_s21 + $0x758] sm:$0xff] }
  0xbf   : > { %1890 = vmatpush3.bf16.msra.mxu0 %v1889_v13  ;;  %v531_v13 = vld [vmem:[%s2463_s21 + $0x790] sm:$0xff] }
  0xc0   : > { %1922 = vmatpush3.bf16.msra.mxu1 %v1921_v15  ;;  %1892 = vmatprep.subr.bf16.mxu0 %v1891_v16  ;;  %v532_v15 = vld [vmem:[%s2463_s21 + $0x798] sm:$0xff]  ;;  %v2719_v16 = vrot.slane %v600_v1, %v2531_v14  ;;  %v502_v14 = vld [vmem:[%s2463_s21 + $0x6a8] sm:$0xff] }
  0xc1   : > { %1924 = vmatprep.subr.bf16.mxu1 %v1923_v20  ;;  %v483_v20 = vld [vmem:[%s2463_s21 + $0x610] sm:$0xff]  ;;  %v1975_v23 = vpack.c.bf16 %v532_v15, %v531_v13  ;;  %v540_v1 = vld [vmem:[%s2463_s21 + $0x7d8] sm:$0xff]  ;;  %v541_v13 = vld [vmem:[%s2463_s21 + $0x7e0] sm:$0xff] }
  0xc2   : > { %v616_v29 = vcombine.high %v2719_v16, %v2719_v16  ;;  %v1945_v30 = vpack.c.bf16 %v484_v21, %v483_v20  ;;  %v542_v15 = vld [vmem:[%s2463_s21 + $0x7e8] sm:$0xff]  ;;  %v493_v20 = vld [vmem:[%s2463_s21 + $0x660] sm:$0xff] }
  0xc3   : > { %1894 = vmatpush3.bf16.msra.mxu0 %v1893_v26  ;;  %v615_v26 = vcombine.high %v2714_v12, %v2714_v12  ;;  %v494_v21 = vld [vmem:[%s2463_s21 + $0x668] sm:$0xff] }
  0xc4   : > { %1926 = vmatpush3.bf16.msra.mxu1 %v1925_v27  ;;  %1896 = vmatprep.subr.bf16.mxu0 %v1895_v28  ;;  %v533_v27 = vld [vmem:[%s2463_s21 + $0x7a0] sm:$0xff]  ;;  %v534_v28 = vld [vmem:[%s2463_s21 + $0x7a8] sm:$0xff] }
  0xc5   : > { %1928 = vmatprep.subr.bf16.mxu1 %v1927_v32  ;;  %v1947_v32 = vpack.c.bf16 %v502_v14, %v501_v25  ;;  %v1979_v36 = vpack.c.bf16 %v534_v28, %v533_v27  ;;  %v511_v25 = vld [vmem:[%s2463_s21 + $0x6f0] sm:$0xff]  ;;  %v512_v14 = vld [vmem:[%s2463_s21 + $0x6f8] sm:$0xff]  ;;  %v1965_v28 = vpack.c.bf16 %v494_v21, %v493_v20 }
  0xc6   : > { %v544_v27 = vld [vmem:[%s2463_s21 + $0x7f8] sm:$0xff] }
  0xc7   : > { %1898 = vmatpush3.bf16.msra.mxu0 %v1897_v39  ;;  %v504_v39 = vld [vmem:[%s2463_s21 + $0x6b8] sm:$0xff] }
  0xc8   : > { %1930 = vmatpush3.bf16.msra.mxu1 %v1929_v40  ;;  %1900 = vmatprep.subr.bf16.mxu0 %v1899_v41  ;;  %v536_v40 = vld [vmem:[%s2463_s21 + $0x7b8] sm:$0xff]  ;;  %v1951_v44 = vpack.c.bf16 %v504_v39, %v503_v38 }
  0xc9   : > { %1932 = vmatprep.subr.bf16.mxu1 %v1931_v47  ;;  %v488_v47 = vld [vmem:[%s2463_s21 + $0x638] sm:$0xff] }
  0xca   : > { %v1216_v20 = vld [vmem:[%s2869_s3 + $0x38] sm:$0xff] (!%p1407_p6) }
  0xcb   : > { %1902 = vmatpush3.bf16.msra.mxu0 %v1901_v54  ;;  %v537_v54 = vld [vmem:[%s2463_s21 + $0x7c0] sm:$0xff] }
  0xcc   : > { %1934 = vmatpush3.bf16.msra.mxu1 %v1933_v55  ;;  %1904 = vmatprep.subr.bf16.mxu0 %v1903_v56  ;;  %v1953_v55 = vpack.c.bf16 %v488_v47, %v487_v45  ;;  %v1985_v56 = vpack.c.bf16 %v520_v50, %v519_v48  ;;  %v1987_v61 = vpack.c.bf16 %v538_v34, %v537_v54 }
  0xcd   : > { %1936 = vmatprep.subr.bf16.mxu1 %v1935_v60  ;;  %v521_v60 = vld [vmem:[%s2463_s21 + $0x740] sm:$0xff] }
  0xcf   : > { %1906 = vmatpush3.bf16.msra.mxu0 %v1905_v2  ;;  %v1957_v2 = vpack.c.bf16 %v490_v59, %v489_v58 }
  0xd0   : > { %1938 = vmatpush3.bf16.msra.mxu1 %v1937_v3  ;;  %1940 = vmatprep.subr.bf16.mxu0 %v1939_v4  ;;  %v1989_v3 = vpack.c.bf16 %v522_v46, %v521_v60  ;;  %v1959_v4 = vpack.c.bf16 %v508_v63, %v507_v62 }
  0xd1   : > { %1972 = vmatprep.subr.bf16.mxu1 %v1971_v8  ;;  %v1991_v8 = vpack.c.bf16 %v540_v1, %v539_v0 }
  0xd2   : > { %978 = vmatmul.mubr.f32.vlgmr.msra.gmra.mrb[4].mxu0 %v2642_v43  ;;  %v486_v43 = vld [vmem:[%s2463_s21 + $0x628] sm:$0xff] }
  0xd3   : > { %1942 = vmatpush3.bf16.msra.mxu0 %v1941_v17  ;;  %1048 = vmatmul.mubr.f32.vlgmr.msra.gmra.mrb[4].mxu1 %v2653_v53  ;;  %v535_v53 = vld [vmem:[%s2463_s21 + $0x7b0] sm:$0xff]  ;;  %v1949_v41 = vpack.c.bf16 %v486_v43, %v485_v33  ;;  %v1961_v17 = vpack.c.bf16 %v492_v6, %v491_v5  ;;  %v1209_v5 = vld [vmem:[%s2869_s3] sm:$0xff] (!%p1407_p6)  ;;  %v1210_v6 = vld [vmem:[%s2869_s3 + $0x8] sm:$0xff] (!%p1407_p6) }
  0xd4   : > { %1974 = vmatpush3.bf16.msra.mxu1 %v1973_v18  ;;  %1944 = vmatprep.subr.bf16.mxu0 %v1943_v19  ;;  %v1983_v49 = vpack.c.bf16 %v536_v40, %v535_v53  ;;  %v1993_v18 = vpack.c.bf16 %v524_v9, %v523_v7  ;;  %v1963_v19 = vpack.c.bf16 %v510_v11, %v509_v10  ;;  %v527_v43 = vld [vmem:[%s2463_s21 + $0x770] sm:$0xff]  ;;  %v2270_v11 = vmov (!%p1407_p6), 0.0  }
  0xd5   : > { %1976 = vmatprep.subr.bf16.mxu1 %v1975_v23  ;;  %1117 = vmatprep.mubr.f32.mxu0 %v615_v26  ;;  %v1995_v23 = vpack.c.bf16 %v542_v15, %v541_v13  ;;  %v543_v26 = vld [vmem:[%s2463_s21 + $0x7f0] sm:$0xff]  ;;  %v2001_v37 = vpack.c.bf16 %v528_v35, %v527_v43  ;;  %v2004_v9 = vpack.c.bf16 (!%p1407_p6), %v1210_v6, %v1209_v5  ;;  %v1213_v15 = vld [vmem:[%s2869_s3 + $0x20] sm:$0xff] (!%p1407_p6) }
  0xd6   : > { %1187 = vmatprep.mubr.f32.mxu1 %v616_v29  ;;  %v1997_v29 = vpack.c.bf16 %v526_v24, %v525_v22  ;;  %v1999_v33 = vpack.c.bf16 %v544_v27, %v543_v26  ;;  %v1211_v7 = vld [vmem:[%s2869_s3 + $0x10] sm:$0xff] (!%p1407_p6)  ;;  %v1212_v10 = vld [vmem:[%s2869_s3 + $0x18] sm:$0xff] (!%p1407_p6)  ;;  %v1217_v22 = vld [vmem:[%s2869_s3 + $0x40] sm:$0xff] (!%p1407_p6) }
  0xd7   : > { %1946 = vmatpush3.bf16.msra.mxu0 %v1945_v30  ;;  %v1967_v30 = vpack.c.bf16 %v512_v14, %v511_v25  ;;  %v2007_v13 = vpack.c.bf16 (!%p1407_p6), %v1212_v10, %v1211_v7  ;;  %v1219_v25 = vld [vmem:[%s2869_s3 + $0x50] sm:$0xff] (!%p1407_p6)  ;;  %v1220_v14 = vld [vmem:[%s2869_s3 + $0x58] sm:$0xff] (!%p1407_p6)  ;;  %v1221_v27 = vld [vmem:[%s2869_s3 + $0x60] sm:$0xff] (!%p1407_p6) }
  0xd8   : > { %1978 = vmatpush3.bf16.msra.mxu1 %v1977_v31  ;;  %1948 = vmatprep.subr.bf16.mxu0 %v1947_v32  ;;  %v495_v31 = vld [vmem:[%s2463_s21 + $0x670] sm:$0xff]  ;;  %v496_v32 = vld [vmem:[%s2463_s21 + $0x678] sm:$0xff]  ;;  %v2019_v26 = vpack.c.bf16 (!%p1407_p6), %v1220_v14, %v1219_v25 }
  0xd9   : > { %1980 = vmatprep.subr.bf16.mxu1 %v1979_v36  ;;  %v1969_v36 = vpack.c.bf16 %v496_v32, %v495_v31  ;;  %v1408_v31 = vld [vmem:[#allocation6] ss:$0 sm:$0xff] (!%p1407_p6)  ;;  %v1223_v32 = vld [vmem:[%s2869_s3 + $0x70] sm:$0xff] (!%p1407_p6) }
  0xdb   : > { %1950 = vmatpush3.bf16.msra.mxu0 %v1949_v41 }
  0xdc   : > { %1982 = vmatpush3.bf16.msra.mxu1 %v1981_v42  ;;  %1952 = vmatprep.subr.bf16.mxu0 %v1951_v44 }
  0xdd   : > { %1984 = vmatprep.subr.bf16.mxu1 %v1983_v49 }
  0xdf   : > { %1954 = vmatpush3.bf16.msra.mxu0 %v1953_v55 }
  0xe0   : > { %1986 = vmatpush3.bf16.msra.mxu1 %v1985_v56  ;;  %1956 = vmatprep.subr.bf16.mxu0 %v1955_v57 }
  0xe1   : > { %1988 = vmatprep.subr.bf16.mxu1 %v1987_v61 }
  0xe3   : > { %1958 = vmatpush3.bf16.msra.mxu0 %v1957_v2  ;;  %v284_v2 = vld [vmem:[#allocation2] sm:$0x3] }
  0xe4   : > { %1990 = vmatpush3.bf16.msra.mxu1 %v1989_v3  ;;  %1960 = vmatprep.subr.bf16.mxu0 %v1959_v4 }
  0xe5   : > { %1992 = vmatprep.subr.bf16.mxu1 %v1991_v8  ;;  %v2268_v8 = vmov (!%p1407_p6), 0.0|0.0  }
  0xe7   : > { %1962 = vmatpush3.bf16.msra.mxu0 %v1961_v17  ;;  %v1214_v17 = vld [vmem:[%s2869_s3 + $0x28] sm:$0xff] (!%p1407_p6) }
  0xe8   : > { %1994 = vmatpush3.bf16.msra.mxu1 %v1993_v18  ;;  %1964 = vmatprep.subr.bf16.mxu0 %v1963_v19  ;;  %v2010_v18 = vpack.c.bf16 (!%p1407_p6), %v1214_v17, %v1213_v15  ;;  %v1215_v19 = vld [vmem:[%s2869_s3 + $0x30] sm:$0xff] (!%p1407_p6) }
  0xe9   : > { %1996 = vmatprep.subr.bf16.mxu1 %v1995_v23  ;;  %v2013_v21 = vpack.c.bf16 (!%p1407_p6), %v1216_v20, %v1215_v19  ;;  %v1218_v23 = vld [vmem:[%s2869_s3 + $0x48] sm:$0xff] (!%p1407_p6) }
  0xea   : > { %v2016_v24 = vpack.c.bf16 (!%p1407_p6), %v1218_v23, %v1217_v22 }
  0xeb   : > { %1966 = vmatpush3.bf16.msra.mxu0 %v1965_v28  ;;  %v1222_v28 = vld [vmem:[%s2869_s3 + $0x68] sm:$0xff] (!%p1407_p6) }
  0xec   : > { %1998 = vmatpush3.bf16.msra.mxu1 %v1997_v29  ;;  %1968 = vmatprep.subr.bf16.mxu0 %v1967_v30  ;;  %v2022_v29 = vpack.c.bf16 (!%p1407_p6), %v1222_v28, %v1221_v27 }
  0xed   : > { %2000 = vmatprep.subr.bf16.mxu1 %v1999_v33  ;;  %v1224_v33 = vld [vmem:[%s2869_s3 + $0x78] sm:$0xff] (!%p1407_p6) }
  0xee   : > { %v2025_v35 = vpack.c.bf16 (!%p1407_p6), %v1224_v33, %v1223_v32 }
  0xef   : > { %1970 = vmatpush3.bf16.msra.mxu0 %v1969_v36 }
  0xf0   : > { %2002 = vmatpush3.bf16.msra.mxu1 %v2001_v37  ;;  %2003 = vmatprep.subr.bf16.mxu0 (!%p1407_p6), %v2268_v8  ;;  %v1409_v37 = vld [vmem:[#allocation8] ss:$0 sm:$0xff] (!%p1407_p6) }
  0xf2   : > { %1118 = vmatmul.mubr.f32.vlgmr.msra.gmra.mrb[6].mxu0 %v2714_v12 }
  0xf3   : > { %1188 = vmatmul.mubr.f32.vlgmr.msra.gmra.mrb[6].mxu1 %v2719_v16  ;;  %1744 = vmatprep.mubr.msk.f32.mxu0 (!%p1407_p6), %vm2269_vm0, %v2270_v11 }
  0xf4   : > { %2005 = vmatpush3.bf16.msra.mxu0 (!%p1407_p6), %v2004_v9 }
  0xf5   : > { %2006 = vmatprep.subr.bf16.mxu0 (!%p1407_p6), %v2268_v8 }
  0xf8   : > { %2008 = vmatpush3.bf16.msra.mxu0 (!%p1407_p6), %v2007_v13 }
  0xf9   : > { %2009 = vmatprep.subr.bf16.mxu0 (!%p1407_p6), %v2268_v8 }
  0xfc   : > { %2011 = vmatpush3.bf16.msra.mxu0 (!%p1407_p6), %v2010_v18 }
  0xfd   : > { %2012 = vmatprep.subr.bf16.mxu0 (!%p1407_p6), %v2268_v8 }
 0x100   : > { %2014 = vmatpush3.bf16.msra.mxu0 (!%p1407_p6), %v2013_v21 }
 0x101   : > { %2015 = vmatprep.subr.bf16.mxu0 (!%p1407_p6), %v2268_v8 }
 0x104   : > { %2017 = vmatpush3.bf16.msra.mxu0 (!%p1407_p6), %v2016_v24 }
 0x105   : > { %2018 = vmatprep.subr.bf16.mxu0 (!%p1407_p6), %v2268_v8 }
 0x108   : > { %2020 = vmatpush3.bf16.msra.mxu0 (!%p1407_p6), %v2019_v26 }
 0x109   : > { %2021 = vmatprep.subr.bf16.mxu0 (!%p1407_p6), %v2268_v8 }
 0x10c   : > { %2023 = vmatpush3.bf16.msra.mxu0 (!%p1407_p6), %v2022_v29 }
 0x10d   : > { %2024 = vmatprep.subr.bf16.mxu0 (!%p1407_p6), %v2268_v8 }
 0x110   : > { %2026 = vmatpush3.bf16.msra.mxu0 (!%p1407_p6), %v2025_v35 }
 0x165   : > { %v1447_v38 = vpop.f32.mrb[0].mxu0 }
 0x166   : > { %v1482_v39 = vpop.f32.mrb[0].mxu1  ;;  %v1448_v53 = vpop.f32.mrb[1].mxu0 }
 0x167   : > { %v1449_v40 = vadd.f32 %v1448_v53, %v1447_v38  ;;  %v1483_v41 = vpop.f32.mrb[1].mxu1 }
 0x168   : > { %v1484_v42 = vadd.f32 %v1483_v41, %v1482_v39 }
 0x16a   : > { %v770_v44 = vadd.f32 %v1484_v42, %v1449_v40 }
 0x185   : > { %v1517_v45 = vpop.f32.mrb[2].mxu0 }
 0x186   : > { %v1518_v47 = vpop.f32.mrb[3].mxu0  ;;  %v1552_v48 = vpop.f32.mrb[2].mxu1 }
 0x187   : > { %v1519_v49 = vadd.f32 %v1518_v47, %v1517_v45  ;;  %v1553_v50 = vpop.f32.mrb[3].mxu1 }
 0x188   : > { %v1554_v51 = vadd.f32 %v1553_v50, %v1552_v48 }
 0x189   : > { %v840_v52 = vadd.f32 %v1519_v49, %v770_v44 }
 0x18b   : > { %v910_v54 = vadd.f32 %v1554_v51, %v840_v52 }
 0x1a5   : > { %v1587_v34 = vpop.f32.mrb[4].mxu0 }
 0x1a6   : > { %v1588_v55 = vpop.f32.mrb[5].mxu0  ;;  %v1622_v12 = vpop.f32.mrb[4].mxu1 }
 0x1a7   : > { %v1589_v56 = vadd.f32 %v1588_v55, %v1587_v34  ;;  %v1623_v16 = vpop.f32.mrb[5].mxu1 }
 0x1a8   : > { %v1624_v57 = vadd.f32 %v1623_v16, %v1622_v12 }
 0x1a9   : > { %v980_v58 = vadd.f32 %v1589_v56, %v910_v54 }
 0x1ab   : > { %v1050_v59 = vadd.f32 %v1624_v57, %v980_v58 }
 0x1c5   : > { %v1657_v60 = vpop.f32.mrb[6].mxu0 }
 0x1c6   : > { %v1658_v61 = vpop.f32.mrb[7].mxu0  ;;  %v1692_v46 = vpop.f32.mrb[6].mxu1 }
 0x1c7   : > { %v1659_v62 = vadd.f32 %v1658_v61, %v1657_v60  ;;  %v1693_v63 = vpop.f32.mrb[7].mxu1 }
 0x1c8   : > { %v1694_v0 = vadd.f32 %v1693_v63, %v1692_v46 }
 0x1c9   : > { %v1120_v1 = vadd.f32 %v1659_v62, %v1050_v59  ;;  %1198 = sbr.rel (%p1407_p6) target bundleno = 690 (0x2b2), region = 60 }
 0x1cb   : > { %v1190_v3 = vadd.f32 %v1694_v0, %v1120_v1 }
 0x1cd   : > { %v1193_v4 = vadd.f32 %v1190_v3, %v284_v2 }
 0x1cf   : > { %1194 = vst [vmem:[#allocation2] sm:$0x3] %v1193_v4 }
 0x1d6   : > { %v1199_v30 = vld [vmem:[#allocation2] sm:$0x3] }
 0x1d7   : > { %v1207_v43 = vadd.f32 %v1408_v31, %v1199_v30 }
 0x1d9   : > { %v1208_v36 = vmax.f32 %v1207_v43, 0.0 }
 0x1db   : > { %1745 = vmatmul.mubr.f32.vlgmr.msra.gmra.mrb[0].mxu0 %v1208_v36 }
 0x2ae   : > { %v1298_v38 = vpop.f32.mrb[0].mxu0 }
 0x2af   : > { %v1299_v39 = vadd.f32 %v1409_v37, %v1298_v38  ;;  %v1746_v53 = vpop.f32.mrb[1].mxu0 }
 0x2b1   : > { %1303 = vst.msk [vmem:[#allocation9] sm:$0x3] %vm1302_vm1, %v1299_v39 }
 0x2b2 PF: > { %p2057_p7 = scmp.eq.s32.totalorder %s2321_s22, 15  ;;  %s2271_s7 = smov [#allocation9]  }
 0x2b3   : > { %s1311_s9 = sshll.u32 %s2271_s7, 4  ;;  %s1312_s9 = int_to_ptr.vmem [resolvable:$true] %s1311_s9 }
 0x2b4   : > { %s2191_s21 = scalar_lea.vmem %s1312_s9, 32  ;;  %p2198_p5 = scmp.lt.s32.totalorder %s1312_s9, %s1312_s9 }
 0x2b5   : > { %p2192_p11 = scmp.ne.s32.totalorder %s1312_s9, %s2191_s21  ;;  %p2199_p9 = scmp.lt.s32.totalorder %s2191_s21, %s2191_s21 }
 0x2b7   : > { %p2193_p12 = pnand %p2192_p11, %p2057_p7  ;;  %p2200_p10 = por %p2199_p9, %p2198_p5 }
 0x2b9   : > { %p2194_p13 = pneg %p2193_p12 }
 0x2bb   : > { %p2201_p1 = pnand %p2200_p10, %p2194_p13 }
 0x2bd   : > { %2204 = shalt.err (!%p2201_p1)
}
 0x2be   : > { %s2205_s13 = scalar_lea.hbm %s2871_s5, 32 }
 0x2bf   : > { %p2206_p8 = scmp.ne.s32.totalorder %s2871_s5, %s2205_s13  ;;  %p2211_p3 = scmp.lt.u32.totalorder %s2205_s13, %s2871_s5 }
 0x2c1   : > { %p2207_p0 = pnand %p2206_p8, %p2057_p7 }
 0x2c3   : > { %p2208_p2 = pneg %p2207_p0 }
 0x2c5   : > { %p2213_p4 = pnand %p2211_p3, %p2208_p2 }
 0x2c7   : > { %2216 = shalt.err (!%p2213_p4)
}
 0x2c8   : > { %2038 = dma.vmem_to_hbm [thread:$0]  (%p2057_p7), %s1312_s9, 32, %s2871_s5, [#allocation5]  }
 0x2c9   : > { %2242 = dma.done.wait (%p2057_p7), [#allocation5], 32  }
 0x2ca   : > { %2244 = vsyncadd (%p2057_p7), [#allocation5], 4294967264 }
 0x2cb PF: > { %p17_p6 = scmp.ge.s32.totalorder %s2324_s23, 18   ;;  %s2887_s18 = smov %s2251_s19 }
 0x2cc   : > { %s2888_s19 = smov %s2255_s20  ;;  %s2889_s20 = smov %s2334_s26 }
 0x2cd   : > { %s2890_s21 = smov %s2324_s23  ;;  %19 = sbr.rel (!%p17_p6) target bundleno = 5 (0x5), region = 96 }
 0x2d4   :  { %1324 = vsyncpa [#allocation4], 1 }
 0x2d5   :  { %1326 = vsyncpa [#allocation4 + $0x1], 1 }
 0x2d6   :  { %1327 = vsyncpa [#allocation7], 1 }
 0x2d7   :  { %1328 = vsyncpa [#allocation5], 1 }
 0x2d8   :  { %1330 = vsyncpa [#allocation5 + $0x1], 1 }

</bundles_post_ra>
